<compile_context>
chip_gen: v5e
topology: v5e:2x2
jax: 0.10.0
libtpu: 0.0.40
codegen_flags: <defaults>
</compile_context>

<pallas_src>
import math

import jax
import jax.numpy as jnp
from jax.experimental import pallas as pl
from jax.experimental.pallas import tpu as pltpu

# ---------------- small BERT-like config (synthetic) ----------------
B, S = 2, 8          # batch, sequence length
H = 32               # hidden size
NH = 2               # attention heads
DH = H // NH         # head dim
INTER = 64           # FFN intermediate size
L = 2                # number of encoder layers
VOCAB = 100
MAXPOS = 16
TYPE_VOCAB = 3       # CrossEncoder resizes token_type vocab to 3
LN_EPS = 1e-12       # BERT LayerNorm eps
DTYPE = jnp.float32

GELU_C = math.sqrt(2.0 / math.pi)


# ---------------- in-kernel helpers ----------------
def _layernorm(v, g, b):
    mean = jnp.mean(v, axis=-1, keepdims=True)
    var = jnp.mean(jnp.square(v - mean), axis=-1, keepdims=True)
    return (v - mean) * jax.lax.rsqrt(var + LN_EPS) * g + b


def _gelu(v):
    # TODO(synk): BERT uses exact erf-GELU; tanh approximation kept for a guaranteed
    # Mosaic lowering (expected ~1e-3-level logit differences vs. PyTorch).
    return 0.5 * v * (1.0 + jnp.tanh(GELU_C * (v + 0.044715 * v * v * v)))


def _split_heads(t2d):
    # [S, H] -> [NH, S, DH]; each head slab stays a (sublane, lane) tile, the new
    # leading head axis is just tile stacking (no relayout of the minor dims).
    return jnp.stack([t2d[:, h * DH:(h + 1) * DH] for h in range(NH)], axis=0)


# ---------------- fused encoder kernel ----------------
def fused_encoder_kernel(mask_ref, emb_ref, embg_ref, embb_ref,
                         qkvw_ref, qkvb_ref, aow_ref, aob_ref,
                         ln1g_ref, ln1b_ref, iw_ref, ib_ref,
                         ow_ref, ob_ref, ln2g_ref, ln2b_ref,
                         headw_ref, headb_ref,
                         logits_ref):
    """One grid step = one batch element. All L layers run in-kernel; the residual
    stream is the fori_loop carry (vreg-resident). Only the [1,1] logit hits HBM."""

    # Additive attention mask, hoisted out of the layer loop (computed once).
    bias = (1.0 - mask_ref[...]) * -10000.0                      # [1, S]

    # Embedding LayerNorm seeds the residual stream.
    x0 = _layernorm(emb_ref[...].astype(jnp.float32),
                    embg_ref[...], embb_ref[...])                # [S, H]

    def layer_body(l, x):
        # Fused QKV projection (1/sqrt(DH) pre-folded into the Q slice).
        qkv = (jnp.dot(x, qkvw_ref[l], preferred_element_type=jnp.float32)
               + qkvb_ref[l])                                     # [S, 3H]

        q = _split_heads(qkv[:, 0:H])                             # [NH, S, DH]
        k = _split_heads(qkv[:, H:2 * H])
        v = _split_heads(qkv[:, 2 * H:3 * H])

        # Head-batched attention (leading-batch dot_generals, like flash-attn).
        s = jnp.einsum('hqd,hkd->hqk', q, k,
                       preferred_element_type=jnp.float32) + bias  # [NH, S, S]
        m = jnp.max(s, axis=-1, keepdims=True)
        p = jnp.exp(s - m)
        p = p * pl.reciprocal(jnp.sum(p, axis=-1, keepdims=True), approx=True)
        ctx = jnp.einsum('hqk,hkd->hqd', p, v,
                         preferred_element_type=jnp.float32)       # [NH, S, DH]

        # Merge heads along lanes, then a single W_o GEMM.
        ctx2d = jnp.concatenate([ctx[h] for h in range(NH)], axis=-1)   # [S, H]
        attn = (jnp.dot(ctx2d, aow_ref[l], preferred_element_type=jnp.float32)
                + aob_ref[l])
        x = _layernorm(attn + x, ln1g_ref[l], ln1b_ref[l])

        # GELU-FFN.
        inter = _gelu(jnp.dot(x, iw_ref[l], preferred_element_type=jnp.float32)
                      + ib_ref[l])
        ffn = (jnp.dot(inter, ow_ref[l], preferred_element_type=jnp.float32)
               + ob_ref[l])
        return _layernorm(ffn + x, ln2g_ref[l], ln2b_ref[l])

    # Unrolled in-kernel layer loop (bounds live ranges, keeps scheduler visibility).
    x = jax.lax.fori_loop(0, L, layer_body, x0, unroll=True)

    # CLS row -> predict_head (mul + lane-reduce; weight stays a [1,H] lane row).
    cls = x[0:1, :]
    logits_ref[...] = (jnp.sum(cls * headw_ref[...], axis=-1, keepdims=True)
                       + headb_ref[...]).astype(logits_ref.dtype)


# ---------------- BlockSpec helpers ----------------
def _batch_spec(shape):
    # [B, *shape] -> one batch slab per grid step (leading dim squeezed)
    return pl.BlockSpec((None,) + shape, lambda b: (b,) + (0,) * len(shape))


def _whole_spec(shape):
    # whole array VMEM-resident, same block for every grid step
    return pl.BlockSpec(shape, lambda b: (0,) * len(shape))


# ---------------- parameters (deterministic, synthetic) ----------------
def init_params(key):
    keys = jax.random.split(key, 4 + L)

    def norm(k, shape, scale=0.02):
        return (jax.random.normal(k, shape, dtype=jnp.float32) * scale).astype(DTYPE)

    params = {
        "word_emb": norm(keys[0], (VOCAB, H)),
        "pos_emb": norm(keys[1], (MAXPOS, H)),
        "type_emb": norm(keys[2], (TYPE_VOCAB, H)),
        "emb_ln_g": jnp.ones((H,), DTYPE),
        "emb_ln_b": jnp.zeros((H,), DTYPE),
        "head": {"w": norm(keys[3], (H, 1)), "b": jnp.zeros((1,), DTYPE)},
        "layers": [],
    }
    for layer_idx in range(L):
        lk = jax.random.split(keys[4 + layer_idx], 6)
        params["layers"].append({
            "q": {"w": norm(lk[0], (H, H)), "b": jnp.zeros((H,), DTYPE)},
            "k": {"w": norm(lk[1], (H, H)), "b": jnp.zeros((H,), DTYPE)},
            "v": {"w": norm(lk[2], (H, H)), "b": jnp.zeros((H,), DTYPE)},
            "ao": {"w": norm(lk[3], (H, H)), "b": jnp.zeros((H,), DTYPE)},
            "attn_ln_g": jnp.ones((H,), DTYPE), "attn_ln_b": jnp.zeros((H,), DTYPE),
            "i": {"w": norm(lk[4], (H, INTER)), "b": jnp.zeros((INTER,), DTYPE)},
            "o": {"w": norm(lk[5], (INTER, H)), "b": jnp.zeros((H,), DTYPE)},
            "out_ln_g": jnp.ones((H,), DTYPE), "out_ln_b": jnp.zeros((H,), DTYPE),
        })
    return params


def pack_params(params):
    """Stack per-layer weights along a leading L axis, fuse QKV, fold the attention
    scale into Q, and reshape the predict_head to a lane-dense [1, H] row."""
    scale = 1.0 / math.sqrt(DH)
    layers = params["layers"]

    def stack(fn):
        return jnp.stack([fn(lp) for lp in layers], axis=0)

    return {
        "word_emb": params["word_emb"],
        "pos_emb": params["pos_emb"],
        "type_emb": params["type_emb"],
        "emb_ln_g": params["emb_ln_g"].reshape(1, H),
        "emb_ln_b": params["emb_ln_b"].reshape(1, H),
        "qkv_w": stack(lambda lp: jnp.concatenate(
            [lp["q"]["w"] * scale, lp["k"]["w"], lp["v"]["w"]], axis=1)),      # [L,H,3H]
        "qkv_b": stack(lambda lp: jnp.concatenate(
            [lp["q"]["b"] * scale, lp["k"]["b"], lp["v"]["b"]]).reshape(1, 3 * H)),
        "ao_w": stack(lambda lp: lp["ao"]["w"]),                               # [L,H,H]
        "ao_b": stack(lambda lp: lp["ao"]["b"].reshape(1, H)),
        "ln1_g": stack(lambda lp: lp["attn_ln_g"].reshape(1, H)),
        "ln1_b": stack(lambda lp: lp["attn_ln_b"].reshape(1, H)),
        "i_w": stack(lambda lp: lp["i"]["w"]),                                 # [L,H,INTER]
        "i_b": stack(lambda lp: lp["i"]["b"].reshape(1, INTER)),
        "o_w": stack(lambda lp: lp["o"]["w"]),                                 # [L,INTER,H]
        "o_b": stack(lambda lp: lp["o"]["b"].reshape(1, H)),
        "ln2_g": stack(lambda lp: lp["out_ln_g"].reshape(1, H)),
        "ln2_b": stack(lambda lp: lp["out_ln_b"].reshape(1, H)),
        "head_w": params["head"]["w"].reshape(1, H),
        "head_b": params["head"]["b"].reshape(1, 1),
    }


# ---------------- forward (== EntityLinkingPredictor.forward) ----------------
def entity_linking_forward(packed, input_ids, attention_mask, token_type_ids):
    Bb, Ss = input_ids.shape
    assert Ss == S

    # Embedding gathers are plain-JAX glue; the embedding LayerNorm runs in-kernel.
    positions = jnp.arange(Ss)[None, :]
    emb = (packed["word_emb"][input_ids]
           + packed["pos_emb"][positions]
           + packed["type_emb"][token_type_ids]).astype(DTYPE)        # [B, S, H]
    mask_f = attention_mask.astype(DTYPE).reshape(Bb, 1, Ss)          # [B, 1, S]

    grid_spec = pltpu.PrefetchScalarGridSpec(
        num_scalar_prefetch=0,
        grid=(Bb,),                          # batch only; layers loop in-kernel
        in_specs=[
            _batch_spec((1, Ss)),            # attention mask
            _batch_spec((Ss, H)),            # embeddings (pre-LayerNorm)
            _whole_spec((1, H)),             # emb LN gamma
            _whole_spec((1, H)),             # emb LN beta
            _whole_spec((L, H, 3 * H)),      # fused QKV weight (Q pre-scaled)
            _whole_spec((L, 1, 3 * H)),      # fused QKV bias
            _whole_spec((L, H, H)),          # attn output proj weight
            _whole_spec((L, 1, H)),          # attn output proj bias
            _whole_spec((L, 1, H)),          # attn LN gamma
            _whole_spec((L, 1, H)),          # attn LN beta
            _whole_spec((L, H, INTER)),      # FFN in weight
            _whole_spec((L, 1, INTER)),      # FFN in bias
            _whole_spec((L, INTER, H)),      # FFN out weight
            _whole_spec((L, 1, H)),          # FFN out bias
            _whole_spec((L, 1, H)),          # out LN gamma
            _whole_spec((L, 1, H)),          # out LN beta
            _whole_spec((1, H)),             # predict_head weight (row)
            _whole_spec((1, 1)),             # predict_head bias
        ],
        out_specs=pl.BlockSpec((None, 1, 1), lambda b: (b, 0, 0)),
    )

    logits = pl.pallas_call(
        fused_encoder_kernel,
        out_shape=jax.ShapeDtypeStruct((Bb, 1, 1), DTYPE),
        grid_spec=grid_spec,
        compiler_params=pltpu.CompilerParams(
            dimension_semantics=("parallel",)),
    )(mask_f, emb, packed["emb_ln_g"], packed["emb_ln_b"],
      packed["qkv_w"], packed["qkv_b"], packed["ao_w"], packed["ao_b"],
      packed["ln1_g"], packed["ln1_b"], packed["i_w"], packed["i_b"],
      packed["o_w"], packed["o_b"], packed["ln2_g"], packed["ln2_b"],
      packed["head_w"], packed["head_b"])

    return logits.reshape(Bb, 1)


# ---------------- pure-JAX reference (correctness check only) ----------------
def reference_forward(params, input_ids, attention_mask, token_type_ids):
    Bb, Ss = input_ids.shape
    positions = jnp.arange(Ss)[None, :]
    emb = (params["word_emb"][input_ids] + params["pos_emb"][positions]
           + params["type_emb"][token_type_ids]).astype(jnp.float32)

    def ln(x, g, b):
        mu = x.mean(-1, keepdims=True)
        var = ((x - mu) ** 2).mean(-1, keepdims=True)
        return (x - mu) * jax.lax.rsqrt(var + LN_EPS) * g + b

    x = ln(emb, params["emb_ln_g"], params["emb_ln_b"])
    bias = (1.0 - attention_mask.astype(jnp.float32))[:, None, None, :] * -10000.0
    scale = 1.0 / math.sqrt(DH)
    for lp in params["layers"]:
        q = x @ lp["q"]["w"] + lp["q"]["b"]
        k = x @ lp["k"]["w"] + lp["k"]["b"]
        v = x @ lp["v"]["w"] + lp["v"]["b"]
        split = lambda t: t.reshape(Bb, Ss, NH, DH).transpose(0, 2, 1, 3)
        s = jnp.einsum("bhqd,bhkd->bhqk", split(q), split(k)) * scale + bias
        p = jax.nn.softmax(s, axis=-1)
        ctx = jnp.einsum("bhqk,bhkd->bhqd", p, split(v))
        ctx = ctx.transpose(0, 2, 1, 3).reshape(Bb, Ss, H)
        x = ln(ctx @ lp["ao"]["w"] + lp["ao"]["b"] + x,
               lp["attn_ln_g"], lp["attn_ln_b"])
        inter = x @ lp["i"]["w"] + lp["i"]["b"]
        inter = 0.5 * inter * (1.0 + jnp.tanh(GELU_C * (inter + 0.044715 * inter ** 3)))
        x = ln(inter @ lp["o"]["w"] + lp["o"]["b"] + x,
               lp["out_ln_g"], lp["out_ln_b"])
    h = x[:, 0, :]
    return h @ params["head"]["w"] + params["head"]["b"]


if __name__ == "__main__":
    key = jax.random.PRNGKey(0)
    pkey, dkey = jax.random.split(key)
    params = init_params(pkey)
    packed = pack_params(params)

    # TODO(synk): checkpoint loading (resume_from_checkpoint / torch.load) has no
    # Pallas equivalent; parameters are initialized deterministically above.
    input_ids = jax.random.randint(dkey, (B, S), 0, VOCAB, dtype=jnp.int32)
    attention_mask = jnp.ones((B, S), dtype=jnp.int32)
    token_type_ids = jnp.concatenate(
        [jnp.zeros((B, S // 2), jnp.int32), jnp.full((B, S - S // 2), 2, jnp.int32)],
        axis=1)  # uses the extended type vocab of size 3

    fwd = jax.jit(entity_linking_forward)
    logits = jax.block_until_ready(fwd(packed, input_ids, attention_mask, token_type_ids))
    assert logits.shape == (B, 1) and logits.dtype == DTYPE

    ref = reference_forward(params, input_ids, attention_mask, token_type_ids)
    assert jnp.allclose(logits, ref, atol=3e-3, rtol=3e-2), (logits, ref)
    print("KERNEL_OK")
</pallas_src>

<mosaic_0001>
module attributes {stable_mosaic.version = 11 : i64} {
  func.func @fused_encoder_kernel(%arg0: i32, %arg1: memref<1x1x8xf32, #tpu.memory_space<vmem>>, %arg2: memref<1x8x32xf32, #tpu.memory_space<vmem>>, %arg3: memref<1x32xf32, #tpu.memory_space<vmem>>, %arg4: memref<1x32xf32, #tpu.memory_space<vmem>>, %arg5: memref<2x32x96xf32, #tpu.memory_space<vmem>>, %arg6: memref<2x1x96xf32, #tpu.memory_space<vmem>>, %arg7: memref<2x32x32xf32, #tpu.memory_space<vmem>>, %arg8: memref<2x1x32xf32, #tpu.memory_space<vmem>>, %arg9: memref<2x1x32xf32, #tpu.memory_space<vmem>>, %arg10: memref<2x1x32xf32, #tpu.memory_space<vmem>>, %arg11: memref<2x32x64xf32, #tpu.memory_space<vmem>>, %arg12: memref<2x1x64xf32, #tpu.memory_space<vmem>>, %arg13: memref<2x64x32xf32, #tpu.memory_space<vmem>>, %arg14: memref<2x1x32xf32, #tpu.memory_space<vmem>>, %arg15: memref<2x1x32xf32, #tpu.memory_space<vmem>>, %arg16: memref<2x1x32xf32, #tpu.memory_space<vmem>>, %arg17: memref<1x32xf32, #tpu.memory_space<vmem>>, %arg18: memref<1x1xf32, #tpu.memory_space<vmem>>, %arg19: memref<1x1x1xf32, #tpu.memory_space<vmem>>) attributes {dimension_semantics = [#tpu.dimension_semantics<parallel>], iteration_bounds = array<i64: 2>, scalar_prefetch = 0 : i64, scratch_operands = 0 : i64, tpu.core_type = #tpu.core_type<tc>, window_params = [{transform_indices = @transform_0, window_bounds = array<i64: 1, 1, 8>}, {transform_indices = @transform_1, window_bounds = array<i64: 1, 8, 32>}, {pipeline_mode = #tpu.pipeline_mode<synchronous>, transform_indices = @transform_2, window_bounds = array<i64: 1, 32>}, {pipeline_mode = #tpu.pipeline_mode<synchronous>, transform_indices = @transform_3, window_bounds = array<i64: 1, 32>}, {pipeline_mode = #tpu.pipeline_mode<synchronous>, transform_indices = @transform_4, window_bounds = array<i64: 2, 32, 96>}, {pipeline_mode = #tpu.pipeline_mode<synchronous>, transform_indices = @transform_5, window_bounds = array<i64: 2, 1, 96>}, {pipeline_mode = #tpu.pipeline_mode<synchronous>, transform_indices = @transform_6, window_bounds = array<i64: 2, 32, 32>}, {pipeline_mode = #tpu.pipeline_mode<synchronous>, transform_indices = @transform_7, window_bounds = array<i64: 2, 1, 32>}, {pipeline_mode = #tpu.pipeline_mode<synchronous>, transform_indices = @transform_8, window_bounds = array<i64: 2, 1, 32>}, {pipeline_mode = #tpu.pipeline_mode<synchronous>, transform_indices = @transform_9, window_bounds = array<i64: 2, 1, 32>}, {pipeline_mode = #tpu.pipeline_mode<synchronous>, transform_indices = @transform_10, window_bounds = array<i64: 2, 32, 64>}, {pipeline_mode = #tpu.pipeline_mode<synchronous>, transform_indices = @transform_11, window_bounds = array<i64: 2, 1, 64>}, {pipeline_mode = #tpu.pipeline_mode<synchronous>, transform_indices = @transform_12, window_bounds = array<i64: 2, 64, 32>}, {pipeline_mode = #tpu.pipeline_mode<synchronous>, transform_indices = @transform_13, window_bounds = array<i64: 2, 1, 32>}, {pipeline_mode = #tpu.pipeline_mode<synchronous>, transform_indices = @transform_14, window_bounds = array<i64: 2, 1, 32>}, {pipeline_mode = #tpu.pipeline_mode<synchronous>, transform_indices = @transform_15, window_bounds = array<i64: 2, 1, 32>}, {pipeline_mode = #tpu.pipeline_mode<synchronous>, transform_indices = @transform_16, window_bounds = array<i64: 1, 32>}, {pipeline_mode = #tpu.pipeline_mode<synchronous>, transform_indices = @transform_17, window_bounds = array<i64: 1, 1>}, {transform_indices = @transform_18, window_bounds = array<i64: 1, 1, 1>}]} {
    %c0 = arith.constant 0 : index
    %c0_0 = arith.constant 0 : index
    %c0_1 = arith.constant 0 : index
    %0 = vector.load %arg1[%c0, %c0_0, %c0_1] : memref<1x1x8xf32, #tpu.memory_space<vmem>>, vector<1x1x8xf32>
    %1 = vector.shape_cast %0 : vector<1x1x8xf32> to vector<1x8xf32>
    %cst = arith.constant 1.000000e+00 : f32
    %2 = vector.broadcast %cst : f32 to vector<1x8xf32>
    %3 = arith.subf %2, %1 : vector<1x8xf32>
    %cst_2 = arith.constant -1.000000e+04 : f32
    %4 = vector.broadcast %cst_2 : f32 to vector<1x8xf32>
    %5 = arith.mulf %3, %4 : vector<1x8xf32>
    %c0_3 = arith.constant 0 : index
    %c0_4 = arith.constant 0 : index
    %c0_5 = arith.constant 0 : index
    %6 = vector.load %arg2[%c0_3, %c0_4, %c0_5] : memref<1x8x32xf32, #tpu.memory_space<vmem>>, vector<1x8x32xf32>
    %7 = vector.shape_cast %6 : vector<1x8x32xf32> to vector<8x32xf32>
    %c0_6 = arith.constant 0 : index
    %c0_7 = arith.constant 0 : index
    %8 = vector.load %arg3[%c0_6, %c0_7] : memref<1x32xf32, #tpu.memory_space<vmem>>, vector<1x32xf32>
    %c0_8 = arith.constant 0 : index
    %c0_9 = arith.constant 0 : index
    %9 = vector.load %arg4[%c0_8, %c0_9] : memref<1x32xf32, #tpu.memory_space<vmem>>, vector<1x32xf32>
    %cst_10 = arith.constant dense<0.000000e+00> : vector<8xf32>
    %10 = vector.multi_reduction <add>, %7, %cst_10 [1] : vector<8x32xf32> to vector<8xf32>
    %11 = vector.shape_cast %10 : vector<8xf32> to vector<8x1xf32>
    %cst_11 = arith.constant 3.200000e+01 : f32
    %12 = vector.broadcast %cst_11 : f32 to vector<8x1xf32>
    %13 = arith.divf %11, %12 : vector<8x1xf32>
    %14 = vector.broadcast %13 : vector<8x1xf32> to vector<8x32xf32>
    %15 = arith.subf %7, %14 : vector<8x32xf32>
    %16 = arith.mulf %15, %15 : vector<8x32xf32>
    %cst_12 = arith.constant dense<0.000000e+00> : vector<8xf32>
    %17 = vector.multi_reduction <add>, %16, %cst_12 [1] : vector<8x32xf32> to vector<8xf32>
    %18 = vector.shape_cast %17 : vector<8xf32> to vector<8x1xf32>
    %cst_13 = arith.constant 3.200000e+01 : f32
    %19 = vector.broadcast %cst_13 : f32 to vector<8x1xf32>
    %20 = arith.divf %18, %19 : vector<8x1xf32>
    %21 = vector.broadcast %13 : vector<8x1xf32> to vector<8x32xf32>
    %22 = arith.subf %7, %21 : vector<8x32xf32>
    %cst_14 = arith.constant 9.99999996E-13 : f32
    %23 = vector.broadcast %cst_14 : f32 to vector<8x1xf32>
    %24 = arith.addf %20, %23 : vector<8x1xf32>
    %25 = math.rsqrt %24 : vector<8x1xf32>
    %26 = vector.broadcast %25 : vector<8x1xf32> to vector<8x32xf32>
    %27 = arith.mulf %22, %26 : vector<8x32xf32>
    %28 = vector.broadcast %8 : vector<1x32xf32> to vector<8x32xf32>
    %29 = arith.mulf %27, %28 : vector<8x32xf32>
    %30 = vector.broadcast %9 : vector<1x32xf32> to vector<8x32xf32>
    %31 = arith.addf %29, %30 : vector<8x32xf32>
    %c0_i32 = arith.constant 0 : i32
    %32 = arith.index_cast %c0_i32 : i32 to index
    %c0_15 = arith.constant 0 : index
    %c0_16 = arith.constant 0 : index
    %33 = vector.load %arg5[%32, %c0_15, %c0_16] : memref<2x32x96xf32, #tpu.memory_space<vmem>>, vector<1x32x96xf32>
    %34 = vector.shape_cast %33 : vector<1x32x96xf32> to vector<32x96xf32>
    %cst_17 = arith.constant dense<0.000000e+00> : vector<8x96xf32>
    %35 = tpu.matmul %31, %34, %cst_17 {dimension_numbers = #tpu.dot_dimension_numbers<[1], [0], [0], [1], [0, 0, 1, 1], [], []>} : vector<8x32xf32>, vector<32x96xf32>, vector<8x96xf32> -> vector<8x96xf32>
    %36 = arith.index_cast %c0_i32 : i32 to index
    %c0_18 = arith.constant 0 : index
    %c0_19 = arith.constant 0 : index
    %37 = vector.load %arg6[%36, %c0_18, %c0_19] : memref<2x1x96xf32, #tpu.memory_space<vmem>>, vector<1x1x96xf32>
    %38 = vector.shape_cast %37 : vector<1x1x96xf32> to vector<1x96xf32>
    %39 = vector.broadcast %38 : vector<1x96xf32> to vector<8x96xf32>
    %40 = arith.addf %35, %39 : vector<8x96xf32>
    %41 = vector.extract_strided_slice %40 {offsets = [0, 0], sizes = [8, 32], strides = [1, 1]} : vector<8x96xf32> to vector<8x32xf32>
    %42 = vector.extract_strided_slice %41 {offsets = [0, 0], sizes = [8, 16], strides = [1, 1]} : vector<8x32xf32> to vector<8x16xf32>
    %43 = vector.extract_strided_slice %41 {offsets = [0, 16], sizes = [8, 16], strides = [1, 1]} : vector<8x32xf32> to vector<8x16xf32>
    %44 = vector.shape_cast %42 : vector<8x16xf32> to vector<1x8x16xf32>
    %45 = vector.shape_cast %43 : vector<8x16xf32> to vector<1x8x16xf32>
    %46 = tpu.concatenate %44, %45 in 0 : vector<1x8x16xf32>, vector<1x8x16xf32> -> vector<2x8x16xf32>
    %47 = vector.extract_strided_slice %40 {offsets = [0, 32], sizes = [8, 32], strides = [1, 1]} : vector<8x96xf32> to vector<8x32xf32>
    %48 = vector.extract_strided_slice %47 {offsets = [0, 0], sizes = [8, 16], strides = [1, 1]} : vector<8x32xf32> to vector<8x16xf32>
    %49 = vector.extract_strided_slice %47 {offsets = [0, 16], sizes = [8, 16], strides = [1, 1]} : vector<8x32xf32> to vector<8x16xf32>
    %50 = vector.shape_cast %48 : vector<8x16xf32> to vector<1x8x16xf32>
    %51 = vector.shape_cast %49 : vector<8x16xf32> to vector<1x8x16xf32>
    %52 = tpu.concatenate %50, %51 in 0 : vector<1x8x16xf32>, vector<1x8x16xf32> -> vector<2x8x16xf32>
    %53 = vector.extract_strided_slice %40 {offsets = [0, 64], sizes = [8, 32], strides = [1, 1]} : vector<8x96xf32> to vector<8x32xf32>
    %54 = vector.extract_strided_slice %53 {offsets = [0, 0], sizes = [8, 16], strides = [1, 1]} : vector<8x32xf32> to vector<8x16xf32>
    %55 = vector.extract_strided_slice %53 {offsets = [0, 16], sizes = [8, 16], strides = [1, 1]} : vector<8x32xf32> to vector<8x16xf32>
    %56 = vector.shape_cast %54 : vector<8x16xf32> to vector<1x8x16xf32>
    %57 = vector.shape_cast %55 : vector<8x16xf32> to vector<1x8x16xf32>
    %58 = tpu.concatenate %56, %57 in 0 : vector<1x8x16xf32>, vector<1x8x16xf32> -> vector<2x8x16xf32>
    "tpu.trace_start"() <{level = 10 : i32, message = "hqd,hkd->hqk"}> : () -> ()
    %cst_20 = arith.constant dense<0.000000e+00> : vector<2x8x8xf32>
    %59 = tpu.matmul %46, %52, %cst_20 {dimension_numbers = #tpu.dot_dimension_numbers<[2], [2], [1], [1], [0, 0, 0, 1, 1, 1], [0], [0]>} : vector<2x8x16xf32>, vector<2x8x16xf32>, vector<2x8x8xf32> -> vector<2x8x8xf32>
    "tpu.trace_stop"() : () -> ()
    %60 = vector.shape_cast %5 : vector<1x8xf32> to vector<1x1x8xf32>
    %61 = vector.broadcast %60 : vector<1x1x8xf32> to vector<2x8x8xf32>
    %62 = arith.addf %59, %61 : vector<2x8x8xf32>
    %cst_21 = arith.constant dense<0xFF800000> : vector<2x8xf32>
    %63 = vector.multi_reduction <maximumf>, %62, %cst_21 [2] : vector<2x8x8xf32> to vector<2x8xf32>
    %64 = vector.shape_cast %63 : vector<2x8xf32> to vector<2x8x1xf32>
    %65 = vector.broadcast %64 : vector<2x8x1xf32> to vector<2x8x8xf32>
    %66 = arith.subf %62, %65 : vector<2x8x8xf32>
    %67 = math.exp %66 : vector<2x8x8xf32>
    %cst_22 = arith.constant dense<0.000000e+00> : vector<2x8xf32>
    %68 = vector.multi_reduction <add>, %67, %cst_22 [2] : vector<2x8x8xf32> to vector<2x8xf32>
    %69 = vector.shape_cast %68 : vector<2x8xf32> to vector<2x8x1xf32>
    %70 = tpu.reciprocal %69 {approx = true} : vector<2x8x1xf32> -> vector<2x8x1xf32>
    %71 = vector.broadcast %70 : vector<2x8x1xf32> to vector<2x8x8xf32>
    %72 = arith.mulf %67, %71 : vector<2x8x8xf32>
    "tpu.trace_start"() <{level = 10 : i32, message = "hqk,hkd->hqd"}> : () -> ()
    %cst_23 = arith.constant dense<0.000000e+00> : vector<2x8x16xf32>
    %73 = tpu.matmul %72, %58, %cst_23 {dimension_numbers = #tpu.dot_dimension_numbers<[2], [1], [1], [2], [0, 0, 0, 1, 1, 2], [0], [0]>} : vector<2x8x8xf32>, vector<2x8x16xf32>, vector<2x8x16xf32> -> vector<2x8x16xf32>
    "tpu.trace_stop"() : () -> ()
    %74 = vector.extract_strided_slice %73 {offsets = [0, 0, 0], sizes = [1, 8, 16], strides = [1, 1, 1]} : vector<2x8x16xf32> to vector<1x8x16xf32>
    %75 = vector.shape_cast %74 : vector<1x8x16xf32> to vector<8x16xf32>
    %76 = vector.extract_strided_slice %73 {offsets = [1, 0, 0], sizes = [1, 8, 16], strides = [1, 1, 1]} : vector<2x8x16xf32> to vector<1x8x16xf32>
    %77 = vector.shape_cast %76 : vector<1x8x16xf32> to vector<8x16xf32>
    %78 = tpu.concatenate %75, %77 in 1 : vector<8x16xf32>, vector<8x16xf32> -> vector<8x32xf32>
    %79 = arith.index_cast %c0_i32 : i32 to index
    %c0_24 = arith.constant 0 : index
    %c0_25 = arith.constant 0 : index
    %80 = vector.load %arg7[%79, %c0_24, %c0_25] : memref<2x32x32xf32, #tpu.memory_space<vmem>>, vector<1x32x32xf32>
    %81 = vector.shape_cast %80 : vector<1x32x32xf32> to vector<32x32xf32>
    %cst_26 = arith.constant dense<0.000000e+00> : vector<8x32xf32>
    %82 = tpu.matmul %78, %81, %cst_26 {dimension_numbers = #tpu.dot_dimension_numbers<[1], [0], [0], [1], [0, 0, 1, 1], [], []>} : vector<8x32xf32>, vector<32x32xf32>, vector<8x32xf32> -> vector<8x32xf32>
    %83 = arith.index_cast %c0_i32 : i32 to index
    %c0_27 = arith.constant 0 : index
    %c0_28 = arith.constant 0 : index
    %84 = vector.load %arg8[%83, %c0_27, %c0_28] : memref<2x1x32xf32, #tpu.memory_space<vmem>>, vector<1x1x32xf32>
    %85 = vector.shape_cast %84 : vector<1x1x32xf32> to vector<1x32xf32>
    %86 = vector.broadcast %85 : vector<1x32xf32> to vector<8x32xf32>
    %87 = arith.addf %82, %86 : vector<8x32xf32>
    %88 = arith.addf %87, %31 : vector<8x32xf32>
    %89 = arith.index_cast %c0_i32 : i32 to index
    %c0_29 = arith.constant 0 : index
    %c0_30 = arith.constant 0 : index
    %90 = vector.load %arg9[%89, %c0_29, %c0_30] : memref<2x1x32xf32, #tpu.memory_space<vmem>>, vector<1x1x32xf32>
    %91 = vector.shape_cast %90 : vector<1x1x32xf32> to vector<1x32xf32>
    %92 = arith.index_cast %c0_i32 : i32 to index
    %c0_31 = arith.constant 0 : index
    %c0_32 = arith.constant 0 : index
    %93 = vector.load %arg10[%92, %c0_31, %c0_32] : memref<2x1x32xf32, #tpu.memory_space<vmem>>, vector<1x1x32xf32>
    %94 = vector.shape_cast %93 : vector<1x1x32xf32> to vector<1x32xf32>
    %cst_33 = arith.constant dense<0.000000e+00> : vector<8xf32>
    %95 = vector.multi_reduction <add>, %88, %cst_33 [1] : vector<8x32xf32> to vector<8xf32>
    %96 = vector.shape_cast %95 : vector<8xf32> to vector<8x1xf32>
    %cst_34 = arith.constant 3.200000e+01 : f32
    %97 = vector.broadcast %cst_34 : f32 to vector<8x1xf32>
    %98 = arith.divf %96, %97 : vector<8x1xf32>
    %99 = vector.broadcast %98 : vector<8x1xf32> to vector<8x32xf32>
    %100 = arith.subf %88, %99 : vector<8x32xf32>
    %101 = arith.mulf %100, %100 : vector<8x32xf32>
    %cst_35 = arith.constant dense<0.000000e+00> : vector<8xf32>
    %102 = vector.multi_reduction <add>, %101, %cst_35 [1] : vector<8x32xf32> to vector<8xf32>
    %103 = vector.shape_cast %102 : vector<8xf32> to vector<8x1xf32>
    %cst_36 = arith.constant 3.200000e+01 : f32
    %104 = vector.broadcast %cst_36 : f32 to vector<8x1xf32>
    %105 = arith.divf %103, %104 : vector<8x1xf32>
    %106 = vector.broadcast %98 : vector<8x1xf32> to vector<8x32xf32>
    %107 = arith.subf %88, %106 : vector<8x32xf32>
    %cst_37 = arith.constant 9.99999996E-13 : f32
    %108 = vector.broadcast %cst_37 : f32 to vector<8x1xf32>
    %109 = arith.addf %105, %108 : vector<8x1xf32>
    %110 = math.rsqrt %109 : vector<8x1xf32>
    %111 = vector.broadcast %110 : vector<8x1xf32> to vector<8x32xf32>
    %112 = arith.mulf %107, %111 : vector<8x32xf32>
    %113 = vector.broadcast %91 : vector<1x32xf32> to vector<8x32xf32>
    %114 = arith.mulf %112, %113 : vector<8x32xf32>
    %115 = vector.broadcast %94 : vector<1x32xf32> to vector<8x32xf32>
    %116 = arith.addf %114, %115 : vector<8x32xf32>
    %117 = arith.index_cast %c0_i32 : i32 to index
    %c0_38 = arith.constant 0 : index
    %c0_39 = arith.constant 0 : index
    %118 = vector.load %arg11[%117, %c0_38, %c0_39] : memref<2x32x64xf32, #tpu.memory_space<vmem>>, vector<1x32x64xf32>
    %119 = vector.shape_cast %118 : vector<1x32x64xf32> to vector<32x64xf32>
    %cst_40 = arith.constant dense<0.000000e+00> : vector<8x64xf32>
    %120 = tpu.matmul %116, %119, %cst_40 {dimension_numbers = #tpu.dot_dimension_numbers<[1], [0], [0], [1], [0, 0, 1, 1], [], []>} : vector<8x32xf32>, vector<32x64xf32>, vector<8x64xf32> -> vector<8x64xf32>
    %121 = arith.index_cast %c0_i32 : i32 to index
    %c0_41 = arith.constant 0 : index
    %c0_42 = arith.constant 0 : index
    %122 = vector.load %arg12[%121, %c0_41, %c0_42] : memref<2x1x64xf32, #tpu.memory_space<vmem>>, vector<1x1x64xf32>
    %123 = vector.shape_cast %122 : vector<1x1x64xf32> to vector<1x64xf32>
    %124 = vector.broadcast %123 : vector<1x64xf32> to vector<8x64xf32>
    %125 = arith.addf %120, %124 : vector<8x64xf32>
    %cst_43 = arith.constant 5.000000e-01 : f32
    %126 = vector.broadcast %cst_43 : f32 to vector<8x64xf32>
    %127 = arith.mulf %126, %125 : vector<8x64xf32>
    %cst_44 = arith.constant 4.471500e-02 : f32
    %128 = vector.broadcast %cst_44 : f32 to vector<8x64xf32>
    %129 = arith.mulf %128, %125 : vector<8x64xf32>
    %130 = arith.mulf %129, %125 : vector<8x64xf32>
    %131 = arith.mulf %130, %125 : vector<8x64xf32>
    %132 = arith.addf %125, %131 : vector<8x64xf32>
    %cst_45 = arith.constant 0.797884583 : f32
    %133 = vector.broadcast %cst_45 : f32 to vector<8x64xf32>
    %134 = arith.mulf %133, %132 : vector<8x64xf32>
    %135 = math.tanh %134 : vector<8x64xf32>
    %cst_46 = arith.constant 1.000000e+00 : f32
    %136 = vector.broadcast %cst_46 : f32 to vector<8x64xf32>
    %137 = arith.addf %136, %135 : vector<8x64xf32>
    %138 = arith.mulf %127, %137 : vector<8x64xf32>
    %139 = arith.index_cast %c0_i32 : i32 to index
    %c0_47 = arith.constant 0 : index
    %c0_48 = arith.constant 0 : index
    %140 = vector.load %arg13[%139, %c0_47, %c0_48] : memref<2x64x32xf32, #tpu.memory_space<vmem>>, vector<1x64x32xf32>
    %141 = vector.shape_cast %140 : vector<1x64x32xf32> to vector<64x32xf32>
    %cst_49 = arith.constant dense<0.000000e+00> : vector<8x32xf32>
    %142 = tpu.matmul %138, %141, %cst_49 {dimension_numbers = #tpu.dot_dimension_numbers<[1], [0], [0], [1], [0, 0, 1, 1], [], []>} : vector<8x64xf32>, vector<64x32xf32>, vector<8x32xf32> -> vector<8x32xf32>
    %143 = arith.index_cast %c0_i32 : i32 to index
    %c0_50 = arith.constant 0 : index
    %c0_51 = arith.constant 0 : index
    %144 = vector.load %arg14[%143, %c0_50, %c0_51] : memref<2x1x32xf32, #tpu.memory_space<vmem>>, vector<1x1x32xf32>
    %145 = vector.shape_cast %144 : vector<1x1x32xf32> to vector<1x32xf32>
    %146 = vector.broadcast %145 : vector<1x32xf32> to vector<8x32xf32>
    %147 = arith.addf %142, %146 : vector<8x32xf32>
    %148 = arith.addf %147, %116 : vector<8x32xf32>
    %149 = arith.index_cast %c0_i32 : i32 to index
    %c0_52 = arith.constant 0 : index
    %c0_53 = arith.constant 0 : index
    %150 = vector.load %arg15[%149, %c0_52, %c0_53] : memref<2x1x32xf32, #tpu.memory_space<vmem>>, vector<1x1x32xf32>
    %151 = vector.shape_cast %150 : vector<1x1x32xf32> to vector<1x32xf32>
    %152 = arith.index_cast %c0_i32 : i32 to index
    %c0_54 = arith.constant 0 : index
    %c0_55 = arith.constant 0 : index
    %153 = vector.load %arg16[%152, %c0_54, %c0_55] : memref<2x1x32xf32, #tpu.memory_space<vmem>>, vector<1x1x32xf32>
    %154 = vector.shape_cast %153 : vector<1x1x32xf32> to vector<1x32xf32>
    %cst_56 = arith.constant dense<0.000000e+00> : vector<8xf32>
    %155 = vector.multi_reduction <add>, %148, %cst_56 [1] : vector<8x32xf32> to vector<8xf32>
    %156 = vector.shape_cast %155 : vector<8xf32> to vector<8x1xf32>
    %cst_57 = arith.constant 3.200000e+01 : f32
    %157 = vector.broadcast %cst_57 : f32 to vector<8x1xf32>
    %158 = arith.divf %156, %157 : vector<8x1xf32>
    %159 = vector.broadcast %158 : vector<8x1xf32> to vector<8x32xf32>
    %160 = arith.subf %148, %159 : vector<8x32xf32>
    %161 = arith.mulf %160, %160 : vector<8x32xf32>
    %cst_58 = arith.constant dense<0.000000e+00> : vector<8xf32>
    %162 = vector.multi_reduction <add>, %161, %cst_58 [1] : vector<8x32xf32> to vector<8xf32>
    %163 = vector.shape_cast %162 : vector<8xf32> to vector<8x1xf32>
    %cst_59 = arith.constant 3.200000e+01 : f32
    %164 = vector.broadcast %cst_59 : f32 to vector<8x1xf32>
    %165 = arith.divf %163, %164 : vector<8x1xf32>
    %166 = vector.broadcast %158 : vector<8x1xf32> to vector<8x32xf32>
    %167 = arith.subf %148, %166 : vector<8x32xf32>
    %cst_60 = arith.constant 9.99999996E-13 : f32
    %168 = vector.broadcast %cst_60 : f32 to vector<8x1xf32>
    %169 = arith.addf %165, %168 : vector<8x1xf32>
    %170 = math.rsqrt %169 : vector<8x1xf32>
    %171 = vector.broadcast %170 : vector<8x1xf32> to vector<8x32xf32>
    %172 = arith.mulf %167, %171 : vector<8x32xf32>
    %173 = vector.broadcast %151 : vector<1x32xf32> to vector<8x32xf32>
    %174 = arith.mulf %172, %173 : vector<8x32xf32>
    %175 = vector.broadcast %154 : vector<1x32xf32> to vector<8x32xf32>
    %176 = arith.addf %174, %175 : vector<8x32xf32>
    %c1_i32 = arith.constant 1 : i32
    %177 = arith.index_cast %c1_i32 : i32 to index
    %c0_61 = arith.constant 0 : index
    %c0_62 = arith.constant 0 : index
    %178 = vector.load %arg5[%177, %c0_61, %c0_62] : memref<2x32x96xf32, #tpu.memory_space<vmem>>, vector<1x32x96xf32>
    %179 = vector.shape_cast %178 : vector<1x32x96xf32> to vector<32x96xf32>
    %cst_63 = arith.constant dense<0.000000e+00> : vector<8x96xf32>
    %180 = tpu.matmul %176, %179, %cst_63 {dimension_numbers = #tpu.dot_dimension_numbers<[1], [0], [0], [1], [0, 0, 1, 1], [], []>} : vector<8x32xf32>, vector<32x96xf32>, vector<8x96xf32> -> vector<8x96xf32>
    %181 = arith.index_cast %c1_i32 : i32 to index
    %c0_64 = arith.constant 0 : index
    %c0_65 = arith.constant 0 : index
    %182 = vector.load %arg6[%181, %c0_64, %c0_65] : memref<2x1x96xf32, #tpu.memory_space<vmem>>, vector<1x1x96xf32>
    %183 = vector.shape_cast %182 : vector<1x1x96xf32> to vector<1x96xf32>
    %184 = vector.broadcast %183 : vector<1x96xf32> to vector<8x96xf32>
    %185 = arith.addf %180, %184 : vector<8x96xf32>
    %186 = vector.extract_strided_slice %185 {offsets = [0, 0], sizes = [8, 32], strides = [1, 1]} : vector<8x96xf32> to vector<8x32xf32>
    %187 = vector.extract_strided_slice %186 {offsets = [0, 0], sizes = [8, 16], strides = [1, 1]} : vector<8x32xf32> to vector<8x16xf32>
    %188 = vector.extract_strided_slice %186 {offsets = [0, 16], sizes = [8, 16], strides = [1, 1]} : vector<8x32xf32> to vector<8x16xf32>
    %189 = vector.shape_cast %187 : vector<8x16xf32> to vector<1x8x16xf32>
    %190 = vector.shape_cast %188 : vector<8x16xf32> to vector<1x8x16xf32>
    %191 = tpu.concatenate %189, %190 in 0 : vector<1x8x16xf32>, vector<1x8x16xf32> -> vector<2x8x16xf32>
    %192 = vector.extract_strided_slice %185 {offsets = [0, 32], sizes = [8, 32], strides = [1, 1]} : vector<8x96xf32> to vector<8x32xf32>
    %193 = vector.extract_strided_slice %192 {offsets = [0, 0], sizes = [8, 16], strides = [1, 1]} : vector<8x32xf32> to vector<8x16xf32>
    %194 = vector.extract_strided_slice %192 {offsets = [0, 16], sizes = [8, 16], strides = [1, 1]} : vector<8x32xf32> to vector<8x16xf32>
    %195 = vector.shape_cast %193 : vector<8x16xf32> to vector<1x8x16xf32>
    %196 = vector.shape_cast %194 : vector<8x16xf32> to vector<1x8x16xf32>
    %197 = tpu.concatenate %195, %196 in 0 : vector<1x8x16xf32>, vector<1x8x16xf32> -> vector<2x8x16xf32>
    %198 = vector.extract_strided_slice %185 {offsets = [0, 64], sizes = [8, 32], strides = [1, 1]} : vector<8x96xf32> to vector<8x32xf32>
    %199 = vector.extract_strided_slice %198 {offsets = [0, 0], sizes = [8, 16], strides = [1, 1]} : vector<8x32xf32> to vector<8x16xf32>
    %200 = vector.extract_strided_slice %198 {offsets = [0, 16], sizes = [8, 16], strides = [1, 1]} : vector<8x32xf32> to vector<8x16xf32>
    %201 = vector.shape_cast %199 : vector<8x16xf32> to vector<1x8x16xf32>
    %202 = vector.shape_cast %200 : vector<8x16xf32> to vector<1x8x16xf32>
    %203 = tpu.concatenate %201, %202 in 0 : vector<1x8x16xf32>, vector<1x8x16xf32> -> vector<2x8x16xf32>
    "tpu.trace_start"() <{level = 10 : i32, message = "hqd,hkd->hqk"}> : () -> ()
    %cst_66 = arith.constant dense<0.000000e+00> : vector<2x8x8xf32>
    %204 = tpu.matmul %191, %197, %cst_66 {dimension_numbers = #tpu.dot_dimension_numbers<[2], [2], [1], [1], [0, 0, 0, 1, 1, 1], [0], [0]>} : vector<2x8x16xf32>, vector<2x8x16xf32>, vector<2x8x8xf32> -> vector<2x8x8xf32>
    "tpu.trace_stop"() : () -> ()
    %205 = vector.shape_cast %5 : vector<1x8xf32> to vector<1x1x8xf32>
    %206 = vector.broadcast %205 : vector<1x1x8xf32> to vector<2x8x8xf32>
    %207 = arith.addf %204, %206 : vector<2x8x8xf32>
    %cst_67 = arith.constant dense<0xFF800000> : vector<2x8xf32>
    %208 = vector.multi_reduction <maximumf>, %207, %cst_67 [2] : vector<2x8x8xf32> to vector<2x8xf32>
    %209 = vector.shape_cast %208 : vector<2x8xf32> to vector<2x8x1xf32>
    %210 = vector.broadcast %209 : vector<2x8x1xf32> to vector<2x8x8xf32>
    %211 = arith.subf %207, %210 : vector<2x8x8xf32>
    %212 = math.exp %211 : vector<2x8x8xf32>
    %cst_68 = arith.constant dense<0.000000e+00> : vector<2x8xf32>
    %213 = vector.multi_reduction <add>, %212, %cst_68 [2] : vector<2x8x8xf32> to vector<2x8xf32>
    %214 = vector.shape_cast %213 : vector<2x8xf32> to vector<2x8x1xf32>
    %215 = tpu.reciprocal %214 {approx = true} : vector<2x8x1xf32> -> vector<2x8x1xf32>
    %216 = vector.broadcast %215 : vector<2x8x1xf32> to vector<2x8x8xf32>
    %217 = arith.mulf %212, %216 : vector<2x8x8xf32>
    "tpu.trace_start"() <{level = 10 : i32, message = "hqk,hkd->hqd"}> : () -> ()
    %cst_69 = arith.constant dense<0.000000e+00> : vector<2x8x16xf32>
    %218 = tpu.matmul %217, %203, %cst_69 {dimension_numbers = #tpu.dot_dimension_numbers<[2], [1], [1], [2], [0, 0, 0, 1, 1, 2], [0], [0]>} : vector<2x8x8xf32>, vector<2x8x16xf32>, vector<2x8x16xf32> -> vector<2x8x16xf32>
    "tpu.trace_stop"() : () -> ()
    %219 = vector.extract_strided_slice %218 {offsets = [0, 0, 0], sizes = [1, 8, 16], strides = [1, 1, 1]} : vector<2x8x16xf32> to vector<1x8x16xf32>
    %220 = vector.shape_cast %219 : vector<1x8x16xf32> to vector<8x16xf32>
    %221 = vector.extract_strided_slice %218 {offsets = [1, 0, 0], sizes = [1, 8, 16], strides = [1, 1, 1]} : vector<2x8x16xf32> to vector<1x8x16xf32>
    %222 = vector.shape_cast %221 : vector<1x8x16xf32> to vector<8x16xf32>
    %223 = tpu.concatenate %220, %222 in 1 : vector<8x16xf32>, vector<8x16xf32> -> vector<8x32xf32>
    %224 = arith.index_cast %c1_i32 : i32 to index
    %c0_70 = arith.constant 0 : index
    %c0_71 = arith.constant 0 : index
    %225 = vector.load %arg7[%224, %c0_70, %c0_71] : memref<2x32x32xf32, #tpu.memory_space<vmem>>, vector<1x32x32xf32>
    %226 = vector.shape_cast %225 : vector<1x32x32xf32> to vector<32x32xf32>
    %cst_72 = arith.constant dense<0.000000e+00> : vector<8x32xf32>
    %227 = tpu.matmul %223, %226, %cst_72 {dimension_numbers = #tpu.dot_dimension_numbers<[1], [0], [0], [1], [0, 0, 1, 1], [], []>} : vector<8x32xf32>, vector<32x32xf32>, vector<8x32xf32> -> vector<8x32xf32>
    %228 = arith.index_cast %c1_i32 : i32 to index
    %c0_73 = arith.constant 0 : index
    %c0_74 = arith.constant 0 : index
    %229 = vector.load %arg8[%228, %c0_73, %c0_74] : memref<2x1x32xf32, #tpu.memory_space<vmem>>, vector<1x1x32xf32>
    %230 = vector.shape_cast %229 : vector<1x1x32xf32> to vector<1x32xf32>
    %231 = vector.broadcast %230 : vector<1x32xf32> to vector<8x32xf32>
    %232 = arith.addf %227, %231 : vector<8x32xf32>
    %233 = arith.addf %232, %176 : vector<8x32xf32>
    %234 = arith.index_cast %c1_i32 : i32 to index
    %c0_75 = arith.constant 0 : index
    %c0_76 = arith.constant 0 : index
    %235 = vector.load %arg9[%234, %c0_75, %c0_76] : memref<2x1x32xf32, #tpu.memory_space<vmem>>, vector<1x1x32xf32>
    %236 = vector.shape_cast %235 : vector<1x1x32xf32> to vector<1x32xf32>
    %237 = arith.index_cast %c1_i32 : i32 to index
    %c0_77 = arith.constant 0 : index
    %c0_78 = arith.constant 0 : index
    %238 = vector.load %arg10[%237, %c0_77, %c0_78] : memref<2x1x32xf32, #tpu.memory_space<vmem>>, vector<1x1x32xf32>
    %239 = vector.shape_cast %238 : vector<1x1x32xf32> to vector<1x32xf32>
    %cst_79 = arith.constant dense<0.000000e+00> : vector<8xf32>
    %240 = vector.multi_reduction <add>, %233, %cst_79 [1] : vector<8x32xf32> to vector<8xf32>
    %241 = vector.shape_cast %240 : vector<8xf32> to vector<8x1xf32>
    %cst_80 = arith.constant 3.200000e+01 : f32
    %242 = vector.broadcast %cst_80 : f32 to vector<8x1xf32>
    %243 = arith.divf %241, %242 : vector<8x1xf32>
    %244 = vector.broadcast %243 : vector<8x1xf32> to vector<8x32xf32>
    %245 = arith.subf %233, %244 : vector<8x32xf32>
    %246 = arith.mulf %245, %245 : vector<8x32xf32>
    %cst_81 = arith.constant dense<0.000000e+00> : vector<8xf32>
    %247 = vector.multi_reduction <add>, %246, %cst_81 [1] : vector<8x32xf32> to vector<8xf32>
    %248 = vector.shape_cast %247 : vector<8xf32> to vector<8x1xf32>
    %cst_82 = arith.constant 3.200000e+01 : f32
    %249 = vector.broadcast %cst_82 : f32 to vector<8x1xf32>
    %250 = arith.divf %248, %249 : vector<8x1xf32>
    %251 = vector.broadcast %243 : vector<8x1xf32> to vector<8x32xf32>
    %252 = arith.subf %233, %251 : vector<8x32xf32>
    %cst_83 = arith.constant 9.99999996E-13 : f32
    %253 = vector.broadcast %cst_83 : f32 to vector<8x1xf32>
    %254 = arith.addf %250, %253 : vector<8x1xf32>
    %255 = math.rsqrt %254 : vector<8x1xf32>
    %256 = vector.broadcast %255 : vector<8x1xf32> to vector<8x32xf32>
    %257 = arith.mulf %252, %256 : vector<8x32xf32>
    %258 = vector.broadcast %236 : vector<1x32xf32> to vector<8x32xf32>
    %259 = arith.mulf %257, %258 : vector<8x32xf32>
    %260 = vector.broadcast %239 : vector<1x32xf32> to vector<8x32xf32>
    %261 = arith.addf %259, %260 : vector<8x32xf32>
    %262 = arith.index_cast %c1_i32 : i32 to index
    %c0_84 = arith.constant 0 : index
    %c0_85 = arith.constant 0 : index
    %263 = vector.load %arg11[%262, %c0_84, %c0_85] : memref<2x32x64xf32, #tpu.memory_space<vmem>>, vector<1x32x64xf32>
    %264 = vector.shape_cast %263 : vector<1x32x64xf32> to vector<32x64xf32>
    %cst_86 = arith.constant dense<0.000000e+00> : vector<8x64xf32>
    %265 = tpu.matmul %261, %264, %cst_86 {dimension_numbers = #tpu.dot_dimension_numbers<[1], [0], [0], [1], [0, 0, 1, 1], [], []>} : vector<8x32xf32>, vector<32x64xf32>, vector<8x64xf32> -> vector<8x64xf32>
    %266 = arith.index_cast %c1_i32 : i32 to index
    %c0_87 = arith.constant 0 : index
    %c0_88 = arith.constant 0 : index
    %267 = vector.load %arg12[%266, %c0_87, %c0_88] : memref<2x1x64xf32, #tpu.memory_space<vmem>>, vector<1x1x64xf32>
    %268 = vector.shape_cast %267 : vector<1x1x64xf32> to vector<1x64xf32>
    %269 = vector.broadcast %268 : vector<1x64xf32> to vector<8x64xf32>
    %270 = arith.addf %265, %269 : vector<8x64xf32>
    %cst_89 = arith.constant 5.000000e-01 : f32
    %271 = vector.broadcast %cst_89 : f32 to vector<8x64xf32>
    %272 = arith.mulf %271, %270 : vector<8x64xf32>
    %cst_90 = arith.constant 4.471500e-02 : f32
    %273 = vector.broadcast %cst_90 : f32 to vector<8x64xf32>
    %274 = arith.mulf %273, %270 : vector<8x64xf32>
    %275 = arith.mulf %274, %270 : vector<8x64xf32>
    %276 = arith.mulf %275, %270 : vector<8x64xf32>
    %277 = arith.addf %270, %276 : vector<8x64xf32>
    %cst_91 = arith.constant 0.797884583 : f32
    %278 = vector.broadcast %cst_91 : f32 to vector<8x64xf32>
    %279 = arith.mulf %278, %277 : vector<8x64xf32>
    %280 = math.tanh %279 : vector<8x64xf32>
    %cst_92 = arith.constant 1.000000e+00 : f32
    %281 = vector.broadcast %cst_92 : f32 to vector<8x64xf32>
    %282 = arith.addf %281, %280 : vector<8x64xf32>
    %283 = arith.mulf %272, %282 : vector<8x64xf32>
    %284 = arith.index_cast %c1_i32 : i32 to index
    %c0_93 = arith.constant 0 : index
    %c0_94 = arith.constant 0 : index
    %285 = vector.load %arg13[%284, %c0_93, %c0_94] : memref<2x64x32xf32, #tpu.memory_space<vmem>>, vector<1x64x32xf32>
    %286 = vector.shape_cast %285 : vector<1x64x32xf32> to vector<64x32xf32>
    %cst_95 = arith.constant dense<0.000000e+00> : vector<8x32xf32>
    %287 = tpu.matmul %283, %286, %cst_95 {dimension_numbers = #tpu.dot_dimension_numbers<[1], [0], [0], [1], [0, 0, 1, 1], [], []>} : vector<8x64xf32>, vector<64x32xf32>, vector<8x32xf32> -> vector<8x32xf32>
    %288 = arith.index_cast %c1_i32 : i32 to index
    %c0_96 = arith.constant 0 : index
    %c0_97 = arith.constant 0 : index
    %289 = vector.load %arg14[%288, %c0_96, %c0_97] : memref<2x1x32xf32, #tpu.memory_space<vmem>>, vector<1x1x32xf32>
    %290 = vector.shape_cast %289 : vector<1x1x32xf32> to vector<1x32xf32>
    %291 = vector.broadcast %290 : vector<1x32xf32> to vector<8x32xf32>
    %292 = arith.addf %287, %291 : vector<8x32xf32>
    %293 = arith.addf %292, %261 : vector<8x32xf32>
    %294 = arith.index_cast %c1_i32 : i32 to index
    %c0_98 = arith.constant 0 : index
    %c0_99 = arith.constant 0 : index
    %295 = vector.load %arg15[%294, %c0_98, %c0_99] : memref<2x1x32xf32, #tpu.memory_space<vmem>>, vector<1x1x32xf32>
    %296 = vector.shape_cast %295 : vector<1x1x32xf32> to vector<1x32xf32>
    %297 = arith.index_cast %c1_i32 : i32 to index
    %c0_100 = arith.constant 0 : index
    %c0_101 = arith.constant 0 : index
    %298 = vector.load %arg16[%297, %c0_100, %c0_101] : memref<2x1x32xf32, #tpu.memory_space<vmem>>, vector<1x1x32xf32>
    %299 = vector.shape_cast %298 : vector<1x1x32xf32> to vector<1x32xf32>
    %cst_102 = arith.constant dense<0.000000e+00> : vector<8xf32>
    %300 = vector.multi_reduction <add>, %293, %cst_102 [1] : vector<8x32xf32> to vector<8xf32>
    %301 = vector.shape_cast %300 : vector<8xf32> to vector<8x1xf32>
    %cst_103 = arith.constant 3.200000e+01 : f32
    %302 = vector.broadcast %cst_103 : f32 to vector<8x1xf32>
    %303 = arith.divf %301, %302 : vector<8x1xf32>
    %304 = vector.broadcast %303 : vector<8x1xf32> to vector<8x32xf32>
    %305 = arith.subf %293, %304 : vector<8x32xf32>
    %306 = arith.mulf %305, %305 : vector<8x32xf32>
    %cst_104 = arith.constant dense<0.000000e+00> : vector<8xf32>
    %307 = vector.multi_reduction <add>, %306, %cst_104 [1] : vector<8x32xf32> to vector<8xf32>
    %308 = vector.shape_cast %307 : vector<8xf32> to vector<8x1xf32>
    %cst_105 = arith.constant 3.200000e+01 : f32
    %309 = vector.broadcast %cst_105 : f32 to vector<8x1xf32>
    %310 = arith.divf %308, %309 : vector<8x1xf32>
    %311 = vector.broadcast %303 : vector<8x1xf32> to vector<8x32xf32>
    %312 = arith.subf %293, %311 : vector<8x32xf32>
    %cst_106 = arith.constant 9.99999996E-13 : f32
    %313 = vector.broadcast %cst_106 : f32 to vector<8x1xf32>
    %314 = arith.addf %310, %313 : vector<8x1xf32>
    %315 = math.rsqrt %314 : vector<8x1xf32>
    %316 = vector.broadcast %315 : vector<8x1xf32> to vector<8x32xf32>
    %317 = arith.mulf %312, %316 : vector<8x32xf32>
    %318 = vector.broadcast %296 : vector<1x32xf32> to vector<8x32xf32>
    %319 = arith.mulf %317, %318 : vector<8x32xf32>
    %320 = vector.broadcast %299 : vector<1x32xf32> to vector<8x32xf32>
    %321 = arith.addf %319, %320 : vector<8x32xf32>
    %c2_i32 = arith.constant 2 : i32
    %322 = vector.extract_strided_slice %321 {offsets = [0, 0], sizes = [1, 32], strides = [1, 1]} : vector<8x32xf32> to vector<1x32xf32>
    %c0_107 = arith.constant 0 : index
    %c0_108 = arith.constant 0 : index
    %323 = vector.load %arg17[%c0_107, %c0_108] : memref<1x32xf32, #tpu.memory_space<vmem>>, vector<1x32xf32>
    %324 = arith.mulf %322, %323 : vector<1x32xf32>
    %cst_109 = arith.constant dense<0.000000e+00> : vector<1xf32>
    %325 = vector.multi_reduction <add>, %324, %cst_109 [1] : vector<1x32xf32> to vector<1xf32>
    %326 = vector.shape_cast %325 : vector<1xf32> to vector<1x1xf32>
    %c0_110 = arith.constant 0 : index
    %c0_111 = arith.constant 0 : index
    %327 = vector.load %arg18[%c0_110, %c0_111] : memref<1x1xf32, #tpu.memory_space<vmem>>, vector<1x1xf32>
    %328 = arith.addf %326, %327 : vector<1x1xf32>
    %c0_112 = arith.constant 0 : index
    %c0_113 = arith.constant 0 : index
    %c0_114 = arith.constant 0 : index
    %329 = vector.load %arg19[%c0_112, %c0_113, %c0_114] : memref<1x1x1xf32, #tpu.memory_space<vmem>>, vector<1x1x1xf32>
    %330 = vector.shape_cast %329 : vector<1x1x1xf32> to vector<1x1xf32>
    %331 = vector.shape_cast %328 : vector<1x1xf32> to vector<1x1x1xf32>
    tpu.vector_store %arg19[%c0_112, %c0_113, %c0_114], %331 {strides = array<i32>} : memref<1x1x1xf32, #tpu.memory_space<vmem>>, vector<1x1x1xf32>,
    return
  }
  func.func @transform_0(%arg0: i32) -> (i32, i32, i32) {
    %c0_i32 = arith.constant 0 : i32
    %c0_i32_0 = arith.constant 0 : i32
    %c0_i32_1 = arith.constant 0 : i32
    return %arg0, %c0_i32, %c0_i32_0 : i32, i32, i32
  }
  func.func @transform_1(%arg0: i32) -> (i32, i32, i32) {
    %c0_i32 = arith.constant 0 : i32
    %c0_i32_0 = arith.constant 0 : i32
    %c0_i32_1 = arith.constant 0 : i32
    return %arg0, %c0_i32, %c0_i32_0 : i32, i32, i32
  }
  func.func @transform_2(%arg0: i32) -> (i32, i32) {
    %c0_i32 = arith.constant 0 : i32
    %c0_i32_0 = arith.constant 0 : i32
    %c0_i32_1 = arith.constant 0 : i32
    return %c0_i32, %c0_i32_0 : i32, i32
  }
  func.func @transform_3(%arg0: i32) -> (i32, i32) {
    %c0_i32 = arith.constant 0 : i32
    %c0_i32_0 = arith.constant 0 : i32
    %c0_i32_1 = arith.constant 0 : i32
    return %c0_i32, %c0_i32_0 : i32, i32
  }
  func.func @transform_4(%arg0: i32) -> (i32, i32, i32) {
    %c0_i32 = arith.constant 0 : i32
    %c0_i32_0 = arith.constant 0 : i32
    %c0_i32_1 = arith.constant 0 : i32
    %c0_i32_2 = arith.constant 0 : i32
    return %c0_i32, %c0_i32_0, %c0_i32_1 : i32, i32, i32
  }
  func.func @transform_5(%arg0: i32) -> (i32, i32, i32) {
    %c0_i32 = arith.constant 0 : i32
    %c0_i32_0 = arith.constant 0 : i32
    %c0_i32_1 = arith.constant 0 : i32
    %c0_i32_2 = arith.constant 0 : i32
    return %c0_i32, %c0_i32_0, %c0_i32_1 : i32, i32, i32
  }
  func.func @transform_6(%arg0: i32) -> (i32, i32, i32) {
    %c0_i32 = arith.constant 0 : i32
    %c0_i32_0 = arith.constant 0 : i32
    %c0_i32_1 = arith.constant 0 : i32
    %c0_i32_2 = arith.constant 0 : i32
    return %c0_i32, %c0_i32_0, %c0_i32_1 : i32, i32, i32
  }
  func.func @transform_7(%arg0: i32) -> (i32, i32, i32) {
    %c0_i32 = arith.constant 0 : i32
    %c0_i32_0 = arith.constant 0 : i32
    %c0_i32_1 = arith.constant 0 : i32
    %c0_i32_2 = arith.constant 0 : i32
    return %c0_i32, %c0_i32_0, %c0_i32_1 : i32, i32, i32
  }
  func.func @transform_8(%arg0: i32) -> (i32, i32, i32) {
    %c0_i32 = arith.constant 0 : i32
    %c0_i32_0 = arith.constant 0 : i32
    %c0_i32_1 = arith.constant 0 : i32
    %c0_i32_2 = arith.constant 0 : i32
    return %c0_i32, %c0_i32_0, %c0_i32_1 : i32, i32, i32
  }
  func.func @transform_9(%arg0: i32) -> (i32, i32, i32) {
    %c0_i32 = arith.constant 0 : i32
    %c0_i32_0 = arith.constant 0 : i32
    %c0_i32_1 = arith.constant 0 : i32
    %c0_i32_2 = arith.constant 0 : i32
    return %c0_i32, %c0_i32_0, %c0_i32_1 : i32, i32, i32
  }
  func.func @transform_10(%arg0: i32) -> (i32, i32, i32) {
    %c0_i32 = arith.constant 0 : i32
    %c0_i32_0 = arith.constant 0 : i32
    %c0_i32_1 = arith.constant 0 : i32
    %c0_i32_2 = arith.constant 0 : i32
    return %c0_i32, %c0_i32_0, %c0_i32_1 : i32, i32, i32
  }
  func.func @transform_11(%arg0: i32) -> (i32, i32, i32) {
    %c0_i32 = arith.constant 0 : i32
    %c0_i32_0 = arith.constant 0 : i32
    %c0_i32_1 = arith.constant 0 : i32
    %c0_i32_2 = arith.constant 0 : i32
    return %c0_i32, %c0_i32_0, %c0_i32_1 : i32, i32, i32
  }
  func.func @transform_12(%arg0: i32) -> (i32, i32, i32) {
    %c0_i32 = arith.constant 0 : i32
    %c0_i32_0 = arith.constant 0 : i32
    %c0_i32_1 = arith.constant 0 : i32
    %c0_i32_2 = arith.constant 0 : i32
    return %c0_i32, %c0_i32_0, %c0_i32_1 : i32, i32, i32
  }
  func.func @transform_13(%arg0: i32) -> (i32, i32, i32) {
    %c0_i32 = arith.constant 0 : i32
    %c0_i32_0 = arith.constant 0 : i32
    %c0_i32_1 = arith.constant 0 : i32
    %c0_i32_2 = arith.constant 0 : i32
    return %c0_i32, %c0_i32_0, %c0_i32_1 : i32, i32, i32
  }
  func.func @transform_14(%arg0: i32) -> (i32, i32, i32) {
    %c0_i32 = arith.constant 0 : i32
    %c0_i32_0 = arith.constant 0 : i32
    %c0_i32_1 = arith.constant 0 : i32
    %c0_i32_2 = arith.constant 0 : i32
    return %c0_i32, %c0_i32_0, %c0_i32_1 : i32, i32, i32
  }
  func.func @transform_15(%arg0: i32) -> (i32, i32, i32) {
    %c0_i32 = arith.constant 0 : i32
    %c0_i32_0 = arith.constant 0 : i32
    %c0_i32_1 = arith.constant 0 : i32
    %c0_i32_2 = arith.constant 0 : i32
    return %c0_i32, %c0_i32_0, %c0_i32_1 : i32, i32, i32
  }
  func.func @transform_16(%arg0: i32) -> (i32, i32) {
    %c0_i32 = arith.constant 0 : i32
    %c0_i32_0 = arith.constant 0 : i32
    %c0_i32_1 = arith.constant 0 : i32
    return %c0_i32, %c0_i32_0 : i32, i32
  }
  func.func @transform_17(%arg0: i32) -> (i32, i32) {
    %c0_i32 = arith.constant 0 : i32
    %c0_i32_0 = arith.constant 0 : i32
    %c0_i32_1 = arith.constant 0 : i32
    return %c0_i32, %c0_i32_0 : i32, i32
  }
  func.func @transform_18(%arg0: i32) -> (i32, i32, i32) {
    %c0_i32 = arith.constant 0 : i32
    %c0_i32_0 = arith.constant 0 : i32
    %c0_i32_1 = arith.constant 0 : i32
    return %arg0, %c0_i32, %c0_i32_0 : i32, i32, i32
  }
}

</mosaic_0001>

<bundles_post_ra>
// kernel: entity_linking_forward.1
= control target key start
LH: loop header
LB: loop body
LE: loop exit
PB: predicated region body
PF: predicated region fallthrough
CT: control target
= control target key end

     0   :  { %s1617_s29 = smov 0   ;;  %s1897_s0 = inlined_call_operand.vmem [shape: f32[2,1,8], index: 0, kind: input, shape index: {}]   ;;  %s1898_s1 = inlined_call_operand.vmem [shape: f32[2,8,32], index: 1, kind: input, shape index: {}]   ;;  %s1899_s2 = inlined_call_operand.vmem [shape: f32[1,32], index: 2, kind: input, shape index: {}]   ;;  %s1900_s3 = inlined_call_operand.vmem [shape: f32[1,32], index: 3, kind: input, shape index: {}]   ;;  %s1901_s4 = inlined_call_operand.vmem [shape: f32[2,32,96], index: 4, kind: input, shape index: {}]   ;;  %s1902_s5 = inlined_call_operand.vmem [shape: f32[2,1,96], index: 5, kind: input, shape index: {}]   ;;  %s1903_s6 = inlined_call_operand.vmem [shape: f32[2,32,32], index: 6, kind: input, shape index: {}]   ;;  %s1904_s7 = inlined_call_operand.vmem [shape: f32[2,1,32], index: 7, kind: input, shape index: {}]   ;;  %s1905_s8 = inlined_call_operand.vmem [shape: f32[2,1,32], index: 8, kind: input, shape index: {}]   ;;  %s1906_s9 = inlined_call_operand.vmem [shape: f32[2,1,32], index: 9, kind: input, shape index: {}]   ;;  %s1907_s10 = inlined_call_operand.vmem [shape: f32[2,32,64], index: 10, kind: input, shape index: {}]   ;;  %s1908_s11 = inlined_call_operand.vmem [shape: f32[2,1,64], index: 11, kind: input, shape index: {}]   ;;  %s1909_s12 = inlined_call_operand.vmem [shape: f32[2,64,32], index: 12, kind: input, shape index: {}]   ;;  %s1910_s13 = inlined_call_operand.vmem [shape: f32[2,1,32], index: 13, kind: input, shape index: {}]   ;;  %s1911_s14 = inlined_call_operand.vmem [shape: f32[2,1,32], index: 14, kind: input, shape index: {}]   ;;  %s1912_s15 = inlined_call_operand.vmem [shape: f32[2,1,32], index: 15, kind: input, shape index: {}]   ;;  %s1913_s16 = inlined_call_operand.vmem [shape: f32[1,32], index: 16, kind: input, shape index: {}]   ;;  %s1914_s17 = inlined_call_operand.<no memory space> [shape: f32[1,1], index: 17, kind: input, shape index: {}]   ;;  %s1915_s18 = inlined_call_operand.vmem [shape: f32[2,1,1], index: 18, kind: output, shape index: {}]  }
   0x1   :  { %1916 = sst [smem:[#allocation3_spill]] %s1897_s0  ;;  %v23_v0 = vstv %s1914_s17 }
   0x2   :  { %1917 = sst [smem:[#allocation4_spill]] %s1898_s1  ;;  %24 = vst [vmem:[#allocation2] sm:$0x1] %v23_v0 }
   0x3   :  { %1918 = sst [smem:[#allocation5_spill]] %s1899_s2 }
   0x4 LB: > { %s1387_s30 = sadd.s32 4294967295, %s1512_s29   ;;  %p1391_p0 = scmp.ge.s32.totalorder %s1512_s29, 1  ;;  %s1512_s29 = sphi %s1617_s29, %s30_s29  }
   0x5   : > { %p521_p1 = scmp.lt.s32.totalorder %s1512_s29, 3 }
   0x7   : > { %p522_p2 = pnand %p1391_p0, %p521_p1 }
   0x8   : > { %p575_p3 = scmp.lt.s32.totalorder (!%p522_p2), %s1387_s30, 1  ;;  %s1919_s1 = sld [smem:[#allocation4_spill]] (!%p522_p2) }
   0x9   : > { %525 = sbr.rel (%p522_p2) target bundleno = 4286 (0x10be), region = 92  ;;  %s1920_s0 = sld [smem:[#allocation5_spill]] (!%p522_p2) }
   0xa   : > { %s1515_s22 = smov (!%p522_p2), 96   ;;  %s1516_s2 = smov (!%p522_p2), 112  }
   0xb   : > { %s1921_s25 = sld [smem:[#allocation3_spill]] (!%p522_p2)  ;;  %s1517_s27 = smov (!%p522_p2), 64  }
   0xc   : > { %s1518_s21 = smov (!%p522_p2), 16  }
   0xe   : > { %s1923_s30 = smov (!%p575_p3, %s1387_s30), 1  ;;  %vm591_vm0 = vcmask 261120   ;;  %v1514_v3 = vmov 32.0   ;;  %v632_v15 = vld [vmem:[%s1901_s4 + $0x18] sm:$0xff]  ;;  %v631_v16 = vld [vmem:[%s1901_s4 + $0x10] sm:$0xff]  ;;  %v630_v17 = vld [vmem:[%s1901_s4 + $0x8] sm:$0xff] }
   0xf   : > { %s1392_s17 = sshll.u32 %s1923_s30, 3  ;;  %1474 = vrcp.f32 %v1514_v3  ;;  %652 = vmatpush.msra.mxu0 %v632_v15  ;;  %v629_v18 = vld [vmem:[%s1901_s4] sm:$0xff]  ;;  %vm668_vm5 = vcmask 130048   ;;  %vm719_vm6 = vcmask 64512   ;;  %vm915_vm10 = vcmask 523264  }
  0x10   : > { %s581_s20 = scalar_lea.vmem %s1919_s1, %s1392_s17  ;;  %v1456_v28 = vld [vmem:[%s1920_s0] ss:$0 sm:$0xff]  ;;  %s584_s17 = scalar_lea.vmem %s1915_s18, %s1923_s30 }
  0x11   : > { %v588_v1 = vld [vmem:[%s581_s20] sm:$0xff]  ;;  %653 = vmatpush.msra.mxu0 %v631_v16  ;;  %s577_s26 = scalar_lea.vmem %s1921_s25, %s1923_s30 }
  0x12   : > { %v592_v2 = vsel %vm591_vm0, %v588_v1, 0.0  ;;  %v1457_v31 = vld [vmem:[%s1900_s3] ss:$0 sm:$0xff] }
  0x13   : > { %593 = vadd.xlane.f32.xlu0 %v592_v2  ;;  %654 = vmatpush.msra.mxu0 %v630_v17  ;;  %v1458_v34 = vld [vmem:[%s1902_s5] ss:$0 sm:$0xff] }
  0x14   : > { %v585_v39 = vld [vmem:[%s577_s26] sm:$0x1] }
  0x15   : > { %v1475_v4 = vpop.eup %1474  ;;  %655 = vmatpush.msra.mxu0 %v629_v18  ;;  %v586_v40 = vsub.f32 1.0, %v585_v39  ;;  %v1461_v39 = vld [vmem:[%s1906_s9] ss:$0 sm:$0xff] }
  0x16   : > { %v596_v5 = vmul.f32 32.0, %v1475_v4  ;;  %vm600_vm1 = vweird.f32 %v1475_v4 }
  0x17   : > { %v587_v41 = vmul.f32 -10000.0, %v586_v40 }
  0x18   : > { %v597_v6 = vsub.f32 1.0, %v596_v5  ;;  %v801_v5 = vld [vmem:[%s1903_s6 + $0x10] sm:$0xff] }
  0x19   : > { %v1671_v42 = vperm.slane %v587_v41, 0 }
  0x1a   : > { %v598_v7 = vmul.f32 %v1475_v4, %v597_v6  ;;  %v800_v6 = vld [vmem:[%s1903_s6 + $0x8] sm:$0xff] }
  0x1c   : > { %v599_v8 = vadd.f32 %v1475_v4, %v598_v7 }
  0x1e   : > { %v1632_v9 = vsel %vm600_vm1, %v1475_v4, %v599_v8  ;;  %v802_v4 = vld [vmem:[%s1903_s6 + $0x18] sm:$0xff]  ;;  %v799_v8 = vld [vmem:[%s1903_s6] sm:$0xff] }
  0x86   : > { %v594_v10 = vpop.xlane.xlu0 %593 }
  0x87   : > { %v602_v11 = vmul.f32 %v1632_v9, %v594_v10 }
  0x89   : > { %v603_v12 = vsub.f32 %v588_v1, %v602_v11 }
  0x8b   : > { %v604_v13 = vmul.f32 %v603_v12, %v603_v12 }
  0x8d   : > { %v605_v14 = vsel %vm591_vm0, %v604_v13, 0.0  ;;  %v1459_v13 = vld [vmem:[%s1904_s7] ss:$0 sm:$0xff] }
  0x8e   : > { %606 = vadd.xlane.f32.xlu0 %v605_v14 }
 0x101   : > { %v607_v19 = vpop.xlane.xlu0 %606 }
 0x102   : > { %v608_v20 = vmul.f32 %v607_v19, %v1632_v9 }
 0x104   : > { %v609_v21 = vadd.f32 1e-12, %v608_v20 }
 0x106   : > { %1476 = vrsqrt.f32 %v609_v21  ;;  %vm616_vm3 = vweird.f32 %v609_v21 }
 0x10c   : > { %v1477_v22 = vpop.eup %1476 }
 0x10d   : > { %v611_v23 = vmul.f32 %v1477_v22, %v609_v21  ;;  %vm617_vm2 = vweird.f32 %v1477_v22 }
 0x10e   : > { %vm618_vm4 = vmor %vm616_vm3, %vm617_vm2 }
 0x10f   : > { %v612_v24 = vmul.f32 %v1477_v22, %v611_v23  ;;  %v866_v23 = vld [vmem:[%s1907_s10 + $0x18] sm:$0xff] }
 0x111   : > { %v613_v25 = vmul.f32 0.5, %v612_v24  ;;  %v865_v24 = vld [vmem:[%s1907_s10 + $0x10] sm:$0xff] }
 0x113   : > { %v614_v26 = vsub.f32 1.5, %v613_v25  ;;  %v864_v25 = vld [vmem:[%s1907_s10 + $0x8] sm:$0xff] }
 0x115   : > { %v615_v27 = vmul.f32 %v1477_v22, %v614_v26  ;;  %v863_v26 = vld [vmem:[%s1907_s10] sm:$0xff] }
 0x117   : > { %v619_v29 = vsel %vm618_vm4, %v1477_v22, %v615_v27 }
 0x118   : > { %v620_v30 = vmul.f32 %v619_v29, %v603_v12 }
 0x11a   : > { %v624_v32 = vmul.f32 %v1456_v28, %v620_v30 }
 0x11c   : > { %v1655_v33 = vadd.f32 %v1457_v31, %v624_v32 }
 0x11e   : > { %1393 = vmatmul.msk.f32.vlgmr.msra.gmra.mxu0 %vm591_vm0, %v1655_v33 }
 0x19b   : > { %v657_v35 = vpop.f32.mrf.mxu0 }
 0x19c   : > { %v658_v36 = vadd.f32 %v1458_v34, %v657_v35 }
 0x19e   : > { %666 = vrot.lane.b32.xlu2 %v658_v36, %s1515_s22  ;;  %661 = vrot.lane.b32.xlu1 %v658_v36, %s1516_s2 }
 0x1f8   : > { %v667_v37 = vpop.permute.xlu2 %666 }
 0x1f9   : > { %1394 = vmatpush.xpose.msk.msra.mxu1 %vm668_vm5, %v667_v37 }
 0x1fc   : > { %1395 = vmatmul.msk.f32.vlgmr.msra.gmra.mxu1 %vm668_vm5, %v658_v36 }
 0x210   : > { %v662_v38 = vpop.permute.xlu1 %661 }
 0x211   : > { %693 = vrot.lane.b32.xlu1 %v662_v38, %s1515_s22 }
 0x279   : > { %v690_v43 = vpop.f32.mrf.mxu1 }
 0x27a   : > { %v691_v44 = vadd.f32 %v690_v43, %v1671_v42  ;;  %v910_v43 = vld [vmem:[%s1909_s12 + $0x38] sm:$0xff] }
 0x27b   : > { %927 = vmatpush.msrb.mxu0 %v910_v43 }
 0x27c   : > { %v720_v45 = vsel %vm719_vm6, %v691_v44, -inf }
 0x27d   : > { %721 = vmax.xlane.f32.xlu0 %v720_v45  ;;  %v908_v45 = vld [vmem:[%s1909_s12 + $0x28] sm:$0xff] }
 0x283   : > { %v694_v46 = vpop.permute.xlu1 %693 }
 0x284   : > { %1396 = vmatpush.xpose.msk.msra.mxu2 %vm668_vm5, %v694_v46  ;;  %v907_v46 = vld [vmem:[%s1909_s12 + $0x20] sm:$0xff] }
 0x287   : > { %1397 = vmatmul.msk.f32.vlgmr.msra.gmra.mxu2 %vm668_vm5, %v662_v38 }
 0x288   : > { %886 = vmatpush.msrb.mxu2 %v866_v23  ;;  %v1464_v23 = vld [vmem:[%s1911_s14] ss:$0 sm:$0xff] }
 0x28a   : > { %887 = vmatpush.msrb.mxu2 %v865_v24 }
 0x28c   : > { %888 = vmatpush.msrb.mxu2 %v864_v25 }
 0x28e   : > { %889 = vmatpush.msrb.mxu2 %v863_v26  ;;  %v1465_v26 = vld [vmem:[%s1912_s15] ss:$0 sm:$0xff] }
 0x291   : > { %768 = vrot.lane.b32.xlu0 %v662_v38, %s1517_s27 }
 0x2f0   : > { %v722_v47 = vpop.xlane.xlu0 %721 }
 0x2f1   : > { %v726_v48 = vsub.f32 %v691_v44, %v722_v47  ;;  %v909_v44 = vld [vmem:[%s1909_s12 + $0x30] sm:$0xff]  ;;  %v906_v47 = vld [vmem:[%s1909_s12 + $0x18] sm:$0xff] }
 0x2f2   : > { %928 = vmatpush.msrb.mxu0 %v909_v44 }
 0x2f3   : > { %v728_v49 = vmul.f32 1.442695, %v726_v48  ;;  %v905_v48 = vld [vmem:[%s1909_s12 + $0x10] sm:$0xff] }
 0x2f4   : > { %929 = vmatpush.msrb.mxu0 %v908_v45 }
 0x2f5   : > { %1478 = vpow2.f32 %v728_v49  ;;  %v904_v49 = vld [vmem:[%s1909_s12 + $0x8] sm:$0xff] }
 0x2f6   : > { %930 = vmatpush.msrb.mxu0 %v907_v46 }
 0x2f8   : > { %931 = vmatpush.msrb.mxu0 %v906_v47 }
 0x2fa   : > { %932 = vmatpush.msrb.mxu0 %v905_v48 }
 0x2fb   : > { %v1479_v50 = vpop.eup %1478 }
 0x2fc   : > { %v732_v51 = vsel %vm719_vm6, %v1479_v50, 0.0  ;;  %933 = vmatpush.msrb.mxu0 %v904_v49 }
 0x2fd   : > { %733 = vadd.xlane.f32.xlu0 %v732_v51  ;;  %v1462_v51 = vld [vmem:[%s1908_s11] ss:$0 sm:$0xff] }
 0x303   : > { %v769_v52 = vpop.permute.xlu0 %768 }
 0x304   : > { %789 = vmatpush.msra.mxu3 %v769_v52 }
 0x30a   : > { %v716_v53 = vpop.f32.mrf.mxu2 }
 0x30b   : > { %v717_v54 = vadd.f32 %v716_v53, %v1671_v42 }
 0x30d   : > { %v723_v55 = vsel %vm719_vm6, %v717_v54, -inf }
 0x30e   : > { %724 = vmax.xlane.f32.xlu2 %v723_v55 }
 0x326   : > { %742 = vrot.lane.b32.xlu2 %v658_v36, %s1517_s27  ;;  %v1460_v36 = vld [vmem:[%s1905_s8] ss:$0 sm:$0xff] }
 0x370   : > { %v734_v56 = vpop.xlane.xlu0 %733 }
 0x371   : > { %1480 = vrcp.f32 %v734_v56 }
 0x377   : > { %v1481_v60 = vpop.eup %1480 }
 0x378   : > { %v740_v62 = vmul.f32 %v1481_v60, %v1479_v50  ;;  %v903_v50 = vld [vmem:[%s1909_s12] sm:$0xff] }
 0x379   : > { %934 = vmatpush.msrb.mxu0 %v903_v50 }
 0x381   : > { %v725_v57 = vpop.xlane.xlu2 %724 }
 0x382   : > { %v727_v58 = vsub.f32 %v717_v54, %v725_v57 }
 0x384   : > { %v730_v59 = vmul.f32 1.442695, %v727_v58 }
 0x386   : > { %1482 = vpow2.f32 %v730_v59 }
 0x389   : > { %v743_v61 = vpop.permute.xlu2 %742 }
 0x38a   : > { %763 = vmatpush.msrb.mxu1 %v743_v61 }
 0x38b   : > { %1398 = vmatmul.msk.f32.vlgmr.msrb.gmra.mxu1 %vm719_vm6, %v740_v62 }
 0x38c   : > { %v1483_v63 = vpop.eup %1482  ;;  %822 = vmatpush.msra.mxu1 %v802_v4 }
 0x38d   : > { %v735_v0 = vsel %vm719_vm6, %v1483_v63, 0.0 }
 0x38e   : > { %736 = vadd.xlane.f32.xlu1 %v735_v0  ;;  %823 = vmatpush.msra.mxu1 %v801_v5 }
 0x390   : > { %824 = vmatpush.msra.mxu1 %v800_v6 }
 0x392   : > { %825 = vmatpush.msra.mxu1 %v799_v8 }
 0x401   : > { %v737_v1 = vpop.xlane.xlu1 %736 }
 0x402   : > { %1484 = vrcp.f32 %v737_v1 }
 0x408   : > { %v1485_v2 = vpop.eup %1484  ;;  %v765_v10 = vpop.f32.mrf.mxu1 }
 0x409   : > { %v741_v3 = vmul.f32 %v1485_v2, %v1483_v63  ;;  %v1463_v63 = vld [vmem:[%s1910_s13] ss:$0 sm:$0xff] }
 0x40b   : > { %1399 = vmatmul.msk.f32.vlgmr.msra.gmra.mxu3 %vm719_vm6, %v741_v3 }
 0x48e   : > { %v791_v7 = vpop.f32.mrf.mxu3 }
 0x48f   : > { %795 = vrot.lane.b32.xlu1 %v791_v7, %s1518_s21 }
 0x501   : > { %v796_v11 = vpop.permute.xlu1 %795 }
 0x502   : > { %v798_v12 = vsel %vm668_vm5, %v765_v10, %v796_v11  ;;  %v1406_v10 = vld [vmem:[%s1901_s4 + $0x38] sm:$0xff]  ;;  %v1405_v11 = vld [vmem:[%s1901_s4 + $0x30] sm:$0xff] }
 0x503   : > { %1400 = vmatmul.msk.f32.vlgmr.msra.gmra.mxu1 %vm591_vm0, %v798_v12  ;;  %997 = vmatpush.msrb.mxu3 %v1406_v10  ;;  %v1404_v12 = vld [vmem:[%s1901_s4 + $0x28] sm:$0xff] }
 0x505   : > { %998 = vmatpush.msrb.mxu3 %v1405_v11 }
 0x507   : > { %999 = vmatpush.msrb.mxu3 %v1404_v12 }
 0x580   : > { %v827_v14 = vpop.f32.mrf.mxu1 }
 0x581   : > { %v828_v15 = vadd.f32 %v1459_v13, %v827_v14  ;;  %v1403_v13 = vld [vmem:[%s1901_s4 + $0x20] sm:$0xff] }
 0x582   : > { %1000 = vmatpush.msrb.mxu3 %v1403_v13 }
 0x583   : > { %v830_v16 = vadd.f32 %v828_v15, %v1655_v33 }
 0x585   : > { %v833_v17 = vsel %vm591_vm0, %v830_v16, 0.0 }
 0x586   : > { %834 = vadd.xlane.f32.xlu2 %v833_v17 }
 0x5f9   : > { %v835_v18 = vpop.xlane.xlu2 %834 }
 0x5fa   : > { %v836_v19 = vmul.f32 %v835_v18, %v1632_v9 }
 0x5fc   : > { %v837_v20 = vsub.f32 %v830_v16, %v836_v19 }
 0x5fe   : > { %v838_v21 = vmul.f32 %v837_v20, %v837_v20 }
 0x600   : > { %v839_v22 = vsel %vm591_vm0, %v838_v21, 0.0 }
 0x601   : > { %840 = vadd.xlane.f32.xlu1 %v839_v22 }
 0x674   : > { %v841_v27 = vpop.xlane.xlu1 %840 }
 0x675   : > { %v842_v28 = vmul.f32 %v841_v27, %v1632_v9 }
 0x677   : > { %v843_v29 = vadd.f32 1e-12, %v842_v28 }
 0x679   : > { %1486 = vrsqrt.f32 %v843_v29  ;;  %vm850_vm8 = vweird.f32 %v843_v29 }
 0x67f   : > { %v1487_v30 = vpop.eup %1486 }
 0x680   : > { %v845_v31 = vmul.f32 %v1487_v30, %v843_v29  ;;  %vm851_vm7 = vweird.f32 %v1487_v30  ;;  %v1466_v29 = vld [vmem:[%s1902_s5 + $0x1] ss:$0 sm:$0xff] }
 0x681   : > { %vm852_vm9 = vmor %vm850_vm8, %vm851_vm7 }
 0x682   : > { %v846_v32 = vmul.f32 %v1487_v30, %v845_v31 }
 0x684   : > { %v847_v33 = vmul.f32 0.5, %v846_v32 }
 0x686   : > { %v848_v34 = vsub.f32 1.5, %v847_v33 }
 0x688   : > { %v849_v35 = vmul.f32 %v1487_v30, %v848_v34 }
 0x68a   : > { %v853_v37 = vsel %vm852_vm9, %v1487_v30, %v849_v35 }
 0x68b   : > { %v854_v38 = vmul.f32 %v853_v37, %v837_v20 }
 0x68d   : > { %v858_v40 = vmul.f32 %v1460_v36, %v854_v38 }
 0x68f   : > { %v862_v41 = vadd.f32 %v1461_v39, %v858_v40 }
 0x691   : > { %1401 = vmatmul.msk.f32.vlgmr.msrb.gmra.mxu2 %vm591_vm0, %v862_v41 }
 0x714   : > { %v891_v52 = vpop.f32.mrf.mxu2 }
 0x715   : > { %v892_v53 = vadd.f32 %v1462_v51, %v891_v52 }
 0x717   : > { %v895_v54 = vmul.f32 0.044715, %v892_v53  ;;  %v894_v60 = vmul.f32 0.5, %v892_v53 }
 0x719   : > { %v896_v55 = vmul.f32 %v895_v54, %v892_v53 }
 0x71b   : > { %v897_v56 = vmul.f32 %v896_v55, %v892_v53 }
 0x71d   : > { %v898_v57 = vadd.f32 %v897_v56, %v892_v53 }
 0x71f   : > { %v899_v58 = vmul.f32 0.7978846, %v898_v57 }
 0x721   : > { %1488 = vtanh.f32 %v899_v58 }
 0x727   : > { %v1489_v59 = vpop.eup %1488 }
 0x728   : > { %v901_v61 = vadd.f32 1.0, %v1489_v59  ;;  %v1418_v59 = vld [vmem:[%s1903_s6 + $0x38] sm:$0xff] }
 0x72a   : > { %v902_v62 = vmul.f32 %v901_v61, %v894_v60  ;;  %v1417_v60 = vld [vmem:[%s1903_s6 + $0x30] sm:$0xff]  ;;  %v1416_v61 = vld [vmem:[%s1903_s6 + $0x28] sm:$0xff] }
 0x72c   : > { %1402 = vmatmul.msk.f32.vlgmr.msrb.gmra.mxu0 %vm915_vm10, %v902_v62 }
 0x7a9   : > { %v936_v0 = vpop.f32.mrf.mxu0 }
 0x7aa   : > { %v937_v1 = vadd.f32 %v1463_v63, %v936_v0  ;;  %v1415_v63 = vld [vmem:[%s1903_s6 + $0x20] sm:$0xff] }
 0x7ac   : > { %v939_v2 = vadd.f32 %v937_v1, %v862_v41 }
 0x7ae   : > { %v942_v3 = vsel %vm591_vm0, %v939_v2, 0.0 }
 0x7af   : > { %943 = vadd.xlane.f32.xlu0 %v942_v3  ;;  %v1467_v3 = vld [vmem:[%s1904_s7 + $0x1] ss:$0 sm:$0xff] }
 0x822   : > { %v944_v4 = vpop.xlane.xlu0 %943 }
 0x823   : > { %v945_v5 = vmul.f32 %v944_v4, %v1632_v9 }
 0x825   : > { %v946_v6 = vsub.f32 %v939_v2, %v945_v5 }
 0x827   : > { %v947_v7 = vmul.f32 %v946_v6, %v946_v6 }
 0x829   : > { %v948_v8 = vsel %vm591_vm0, %v947_v7, 0.0 }
 0x82a   : > { %949 = vadd.xlane.f32.xlu0 %v948_v8 }
 0x89d   : > { %v950_v14 = vpop.xlane.xlu0 %949 }
 0x89e   : > { %v951_v15 = vmul.f32 %v950_v14, %v1632_v9  ;;  %v1426_v14 = vld [vmem:[%s1907_s10 + $0x38] sm:$0xff] }
 0x89f   : > { %1232 = vmatpush.msra.mxu0 %v1426_v14 }
 0x8a0   : > { %v952_v16 = vadd.f32 1e-12, %v951_v15  ;;  %v1425_v15 = vld [vmem:[%s1907_s10 + $0x30] sm:$0xff] }
 0x8a1   : > { %1233 = vmatpush.msra.mxu0 %v1425_v15 }
 0x8a2   : > { %1490 = vrsqrt.f32 %v952_v16  ;;  %vm959_vm12 = vweird.f32 %v952_v16 }
 0x8a8   : > { %v1491_v17 = vpop.eup %1490 }
 0x8a9   : > { %v954_v18 = vmul.f32 %v1491_v17, %v952_v16  ;;  %vm960_vm11 = vweird.f32 %v1491_v17  ;;  %v1424_v16 = vld [vmem:[%s1907_s10 + $0x28] sm:$0xff] }
 0x8aa   : > { %vm961_vm13 = vmor %vm959_vm12, %vm960_vm11  ;;  %1234 = vmatpush.msra.mxu0 %v1424_v16 }
 0x8ab   : > { %v955_v19 = vmul.f32 %v1491_v17, %v954_v18 }
 0x8ad   : > { %v956_v20 = vmul.f32 0.5, %v955_v19 }
 0x8af   : > { %v957_v21 = vsub.f32 1.5, %v956_v20 }
 0x8b1   : > { %v958_v22 = vmul.f32 %v1491_v17, %v957_v21 }
 0x8b3   : > { %v962_v24 = vsel %vm961_vm13, %v1491_v17, %v958_v22  ;;  %v1423_v17 = vld [vmem:[%s1907_s10 + $0x20] sm:$0xff] }
 0x8b4   : > { %v963_v25 = vmul.f32 %v962_v24, %v946_v6  ;;  %1235 = vmatpush.msra.mxu0 %v1423_v17  ;;  %v1327_v17 = vld [vmem:[#allocation2] sm:$0x1] }
 0x8b6   : > { %v967_v27 = vmul.f32 %v1464_v23, %v963_v25 }
 0x8b8   : > { %v1780_v28 = vadd.f32 %v1465_v26, %v967_v27  ;;  %v1468_v27 = vld [vmem:[%s1905_s8 + $0x1] ss:$0 sm:$0xff] }
 0x8ba   : > { %1408 = vmatmul.msk.f32.vlgmr.msrb.gmra.mxu3 %vm591_vm0, %v1780_v28 }
 0x93d   : > { %v1002_v30 = vpop.f32.mrf.mxu3 }
 0x93e   : > { %v1003_v31 = vadd.f32 %v1466_v29, %v1002_v30  ;;  %v1469_v30 = vld [vmem:[%s1906_s9 + $0x1] ss:$0 sm:$0xff] }
 0x940   : > { %1006 = vrot.lane.b32.xlu0 %v1003_v31, %s1516_s2 }
 0x948   : > { %1008 = vrot.lane.b32.xlu0 %v1003_v31, %s1515_s22 }
 0x9b2   : > { %v1007_v32 = vpop.permute.xlu0 %1006 }
 0x9b3   : > { %1034 = vrot.lane.b32.xlu2 %v1007_v32, %s1515_s22 }
 0x9ba   : > { %v1009_v33 = vpop.permute.xlu0 %1008 }
 0x9bb   : > { %1409 = vmatpush.xpose.msk.msrb.mxu1 %vm668_vm5, %v1009_v33  ;;  %1108 = vrot.lane.b32.xlu2 %v1007_v32, %s1517_s27  ;;  %v1436_v33 = vld [vmem:[%s1909_s12 + $0x78] sm:$0xff] }
 0x9be   : > { %1410 = vmatmul.msk.f32.vlgmr.msrb.gmra.mxu1 %vm668_vm5, %v1003_v31 }
 0x9c3   : > { %1082 = vrot.lane.b32.xlu2 %v1003_v31, %s1517_s27 }
 0xa0d   : > { %v1035_v34 = vpop.permute.xlu2 %1034 }
 0xa0e   : > { %1411 = vmatpush.xpose.msk.msra.mxu2 %vm668_vm5, %v1035_v34  ;;  %v1435_v34 = vld [vmem:[%s1909_s12 + $0x70] sm:$0xff] }
 0xa11   : > { %1412 = vmatmul.msk.f32.vlgmr.msra.gmra.mxu2 %vm668_vm5, %v1007_v32 }
 0xa12   : > { %1164 = vmatpush.msrb.mxu2 %v1418_v59 }
 0xa14   : > { %1165 = vmatpush.msrb.mxu2 %v1417_v60 }
 0xa15   : > { %v1109_v35 = vpop.permute.xlu2 %1108 }
 0xa16   : > { %1129 = vmatpush.msra.mxu1 %v1109_v35  ;;  %1166 = vmatpush.msrb.mxu2 %v1416_v61  ;;  %v1434_v35 = vld [vmem:[%s1909_s12 + $0x68] sm:$0xff] }
 0xa18   : > { %1167 = vmatpush.msrb.mxu2 %v1415_v63 }
 0xa1d   : > { %v1083_v36 = vpop.permute.xlu2 %1082 }
 0xa1e   : > { %1103 = vmatpush.msra.mxu3 %v1083_v36  ;;  %v1433_v36 = vld [vmem:[%s1909_s12 + $0x60] sm:$0xff] }
 0xa20   : > { %1274 = vmatpush.msrb.mxu3 %v1436_v33 }
 0xa22   : > { %1275 = vmatpush.msrb.mxu3 %v1435_v34 }
 0xa24   : > { %1276 = vmatpush.msrb.mxu3 %v1434_v35 }
 0xa26   : > { %1277 = vmatpush.msrb.mxu3 %v1433_v36 }
 0xa3b   : > { %v1031_v37 = vpop.f32.mrf.mxu1 }
 0xa3c   : > { %v1032_v38 = vadd.f32 %v1031_v37, %v1671_v42  ;;  %v1432_v37 = vld [vmem:[%s1909_s12 + $0x58] sm:$0xff] }
 0xa3d   : > { %1278 = vmatpush.msrb.mxu3 %v1432_v37 }
 0xa3e   : > { %v1060_v39 = vsel %vm719_vm6, %v1032_v38, -inf }
 0xa3f   : > { %1061 = vmax.xlane.f32.xlu0 %v1060_v39  ;;  %v1430_v39 = vld [vmem:[%s1909_s12 + $0x48] sm:$0xff] }
 0xa94   : > { %v1057_v40 = vpop.f32.mrf.mxu2 }
 0xa95   : > { %v1058_v41 = vadd.f32 %v1057_v40, %v1671_v42  ;;  %v1429_v40 = vld [vmem:[%s1909_s12 + $0x40] sm:$0xff] }
 0xa97   : > { %v1063_v43 = vsel %vm719_vm6, %v1058_v41, -inf }
 0xa98   : > { %1064 = vmax.xlane.f32.xlu1 %v1063_v43 }
 0xab2   : > { %v1062_v44 = vpop.xlane.xlu0 %1061 }
 0xab3   : > { %v1066_v47 = vsub.f32 %v1032_v38, %v1062_v44  ;;  %v1431_v38 = vld [vmem:[%s1909_s12 + $0x50] sm:$0xff] }
 0xab4   : > { %1279 = vmatpush.msrb.mxu3 %v1431_v38 }
 0xab5   : > { %v1068_v49 = vmul.f32 1.442695, %v1066_v47 }
 0xab6   : > { %1280 = vmatpush.msrb.mxu3 %v1430_v39 }
 0xab8   : > { %1281 = vmatpush.msrb.mxu3 %v1429_v40 }
 0xb0b   : > { %v1065_v45 = vpop.xlane.xlu1 %1064 }
 0xb0c   : > { %v1067_v46 = vsub.f32 %v1058_v41, %v1065_v45  ;;  %v1470_v41 = vld [vmem:[%s1908_s11 + $0x1] ss:$0 sm:$0xff] }
 0xb0e   : > { %v1070_v48 = vmul.f32 1.442695, %v1067_v46 }
 0xb10   : > { %1492 = vpow2.f32 %v1070_v48 }
 0xb11   : > { %1494 = vpow2.f32 %v1068_v49 }
 0xb16   : > { %v1493_v50 = vpop.eup %1492 }
 0xb17   : > { %v1075_v51 = vsel %vm719_vm6, %v1493_v50, 0.0  ;;  %v1495_v52 = vpop.eup %1494 }
 0xb18   : > { %1076 = vadd.xlane.f32.xlu1 %v1075_v51  ;;  %v1072_v53 = vsel %vm719_vm6, %v1495_v52, 0.0 }
 0xb20   : > { %1073 = vadd.xlane.f32.xlu1 %v1072_v53 }
 0xb8b   : > { %v1077_v42 = vpop.xlane.xlu1 %1076 }
 0xb8c   : > { %1496 = vrcp.f32 %v1077_v42  ;;  %v1471_v42 = vld [vmem:[%s1910_s13 + $0x1] ss:$0 sm:$0xff] }
 0xb92   : > { %v1497_v54 = vpop.eup %1496 }
 0xb93   : > { %v1081_v55 = vmul.f32 %v1497_v54, %v1493_v50  ;;  %v1074_v56 = vpop.xlane.xlu1 %1073 }
 0xb94   : > { %1498 = vrcp.f32 %v1074_v56 }
 0xb95   : > { %1414 = vmatmul.msk.f32.vlgmr.msra.gmra.mxu1 %vm719_vm6, %v1081_v55 }
 0xb9a   : > { %v1499_v57 = vpop.eup %1498 }
 0xb9b   : > { %v1080_v58 = vmul.f32 %v1499_v57, %v1495_v52 }
 0xb9d   : > { %1413 = vmatmul.msk.f32.vlgmr.msra.gmra.mxu3 %vm719_vm6, %v1080_v58 }
 0xc12   : > { %v1131_v62 = vpop.f32.mrf.mxu1 }
 0xc13   : > { %1135 = vrot.lane.b32.xlu1 %v1131_v62, %s1518_s21 }
 0xc20   : > { %v1105_v0 = vpop.f32.mrf.mxu3 }
 0xc85   : > { %v1136_v1 = vpop.permute.xlu1 %1135 }
 0xc86   : > { %v1138_v2 = vsel %vm668_vm5, %v1105_v0, %v1136_v1  ;;  %vm1329_vm5 = vcmask 0  }
 0xc87   : > { %1420 = vmatmul.msk.f32.vlgmr.msrb.gmra.mxu2 %vm591_vm0, %v1138_v2 }
 0xd0a   : > { %v1169_v4 = vpop.f32.mrf.mxu2 }
 0xd0b   : > { %v1170_v5 = vadd.f32 %v1467_v3, %v1169_v4 }
 0xd0d   : > { %v1172_v6 = vadd.f32 %v1170_v5, %v1780_v28 }
 0xd0f   : > { %v1177_v7 = vsel %vm591_vm0, %v1172_v6, 0.0 }
 0xd10   : > { %1178 = vadd.xlane.f32.xlu2 %v1177_v7 }
 0xd83   : > { %v1179_v8 = vpop.xlane.xlu2 %1178 }
 0xd84   : > { %v1180_v10 = vmul.f32 %v1179_v8, %v1632_v9  ;;  %v1472_v8 = vld [vmem:[%s1911_s14 + $0x1] ss:$0 sm:$0xff] }
 0xd86   : > { %v1181_v11 = vsub.f32 %v1172_v6, %v1180_v10 }
 0xd88   : > { %v1182_v12 = vmul.f32 %v1181_v11, %v1181_v11 }
 0xd8a   : > { %v1183_v13 = vsel %vm591_vm0, %v1182_v12, 0.0 }
 0xd8b   : > { %1184 = vadd.xlane.f32.xlu0 %v1183_v13  ;;  %v1321_v13 = vld [vmem:[%s1913_s16] sm:$0x1] }
 0xdfe   : > { %v1185_v18 = vpop.xlane.xlu0 %1184 }
 0xdff   : > { %v1186_v19 = vmul.f32 %v1185_v18, %v1632_v9 }
 0xe01   : > { %v1187_v20 = vadd.f32 1e-12, %v1186_v19 }
 0xe03   : > { %1500 = vrsqrt.f32 %v1187_v20  ;;  %vm1194_vm15 = vweird.f32 %v1187_v20 }
 0xe09   : > { %v1501_v21 = vpop.eup %1500 }
 0xe0a   : > { %v1189_v22 = vmul.f32 %v1501_v21, %v1187_v20  ;;  %vm1195_vm14 = vweird.f32 %v1501_v21 }
 0xe0b   : > { %vm1196_vm1 = vmor %vm1194_vm15, %vm1195_vm14 }
 0xe0c   : > { %v1190_v23 = vmul.f32 %v1501_v21, %v1189_v22 }
 0xe0e   : > { %v1191_v24 = vmul.f32 0.5, %v1190_v23 }
 0xe10   : > { %v1192_v25 = vsub.f32 1.5, %v1191_v24 }
 0xe12   : > { %v1193_v26 = vmul.f32 %v1501_v21, %v1192_v25 }
 0xe14   : > { %v1197_v28 = vsel %vm1196_vm1, %v1501_v21, %v1193_v26 }
 0xe15   : > { %v1198_v29 = vmul.f32 %v1197_v28, %v1181_v11 }
 0xe17   : > { %v1202_v31 = vmul.f32 %v1468_v27, %v1198_v29 }
 0xe19   : > { %v1206_v32 = vadd.f32 %v1469_v30, %v1202_v31 }
 0xe1b   : > { %1428 = vmatmul.msk.f32.vlgmr.msra.gmra.mxu0 %vm591_vm0, %v1206_v32 }
 0xe98   : > { %v1237_v43 = vpop.f32.mrf.mxu0 }
 0xe99   : > { %v1238_v44 = vadd.f32 %v1470_v41, %v1237_v43 }
 0xe9b   : > { %v1241_v45 = vmul.f32 0.044715, %v1238_v44  ;;  %v1240_v51 = vmul.f32 0.5, %v1238_v44 }
 0xe9d   : > { %v1242_v46 = vmul.f32 %v1241_v45, %v1238_v44 }
 0xe9f   : > { %v1243_v47 = vmul.f32 %v1242_v46, %v1238_v44 }
 0xea1   : > { %v1244_v48 = vadd.f32 %v1243_v47, %v1238_v44 }
 0xea3   : > { %v1245_v49 = vmul.f32 0.7978846, %v1244_v48 }
 0xea5   : > { %1502 = vtanh.f32 %v1245_v49 }
 0xeab   : > { %v1503_v50 = vpop.eup %1502 }
 0xeac   : > { %v1247_v52 = vadd.f32 1.0, %v1503_v50 }
 0xeae   : > { %v1248_v53 = vmul.f32 %v1247_v52, %v1240_v51 }
 0xeb0   : > { %1438 = vmatmul.msk.f32.vlgmr.msrb.gmra.mxu3 %vm915_vm10, %v1248_v53 }
 0xf33   : > { %v1283_v54 = vpop.f32.mrf.mxu3 }
 0xf34   : > { %v1284_v55 = vadd.f32 %v1471_v42, %v1283_v54 }
 0xf36   : > { %v1286_v56 = vadd.f32 %v1284_v55, %v1206_v32 }
 0xf38   : > { %v1291_v57 = vsel %vm591_vm0, %v1286_v56, 0.0 }
 0xf39   : > { %1292 = vadd.xlane.f32.xlu1 %v1291_v57 }
 0xfac   : > { %v1293_v58 = vpop.xlane.xlu1 %1292 }
 0xfad   : > { %v1294_v59 = vmul.f32 %v1293_v58, %v1632_v9 }
 0xfaf   : > { %v1295_v60 = vsub.f32 %v1286_v56, %v1294_v59 }
 0xfb1   : > { %v1296_v61 = vmul.f32 %v1295_v60, %v1295_v60 }
 0xfb3   : > { %v1297_v62 = vsel %vm591_vm0, %v1296_v61, 0.0  ;;  %vm1323_vm0 = vcmask 253952  }
 0xfb4   : > { %1298 = vadd.xlane.f32.xlu0 %v1297_v62 }
0x1027   : > { %v1299_v63 = vpop.xlane.xlu0 %1298 }
0x1028   : > { %v1300_v0 = vmul.f32 %v1299_v63, %v1632_v9  ;;  %v1473_v9 = vld [vmem:[%s1912_s15 + $0x1] ss:$0 sm:$0xff] }
0x102a   : > { %v1301_v1 = vadd.f32 1e-12, %v1300_v0 }
0x102c   : > { %1504 = vrsqrt.f32 %v1301_v1  ;;  %vm1308_vm3 = vweird.f32 %v1301_v1 }
0x1032   : > { %v1505_v2 = vpop.eup %1504 }
0x1033   : > { %v1303_v3 = vmul.f32 %v1505_v2, %v1301_v1  ;;  %vm1309_vm2 = vweird.f32 %v1505_v2 }
0x1034   : > { %vm1310_vm4 = vmor %vm1308_vm3, %vm1309_vm2 }
0x1035   : > { %v1304_v4 = vmul.f32 %v1505_v2, %v1303_v3 }
0x1037   : > { %v1305_v5 = vmul.f32 0.5, %v1304_v4 }
0x1039   : > { %v1306_v6 = vsub.f32 1.5, %v1305_v5 }
0x103b   : > { %v1307_v7 = vmul.f32 %v1505_v2, %v1306_v6 }
0x103d   : > { %v1311_v10 = vsel %vm1310_vm4, %v1505_v2, %v1307_v7 }
0x103e   : > { %v1312_v11 = vmul.f32 %v1311_v10, %v1295_v60 }
0x1040   : > { %v1316_v12 = vmul.f32 %v1472_v8, %v1312_v11 }
0x1042   : > { %v1320_v14 = vadd.f32 %v1473_v9, %v1316_v12 }
0x1044   : > { %v1322_v15 = vmul.f32 %v1321_v13, %v1320_v14 }
0x1046   : > { %v1324_v16 = vsel %vm1323_vm0, %v1322_v15, 0.0 }
0x1047   : > { %1325 = vadd.xlane.f32.xlu0 %v1324_v16 }
0x10ba   : > { %v1326_v18 = vpop.xlane.xlu0 %1325 }
0x10bb   : > { %v1328_v19 = vadd.f32 %v1327_v17, %v1326_v18 }
0x10bd   : > { %1330 = vst.msk [vmem:[%s584_s17] sm:$0x1] %vm1329_vm5, %v1328_v19 }
0x10be PF: > { %s30_s29 = sadd.s32 1, %s1512_s29  }
0x10bf   : > { %p27_p4 = scmp.ge.s32.totalorder %s30_s29, 4  }
0x10c1   :  { %29 = sbr.rel (!%p27_p4) target bundleno = 4 (0x4), region = 137 }

</bundles_post_ra>
